<compile_context>
chip_gen: v7x
topology: tpu7x:2x2x1
jax: 0.10.0
libtpu: 0.0.40
codegen_flags: <defaults>
</compile_context>

<pallas_src>
import functools

import jax
import jax.numpy as jnp
from jax import lax
from jax.experimental import pallas as pl
from jax.experimental.pallas import tpu as pltpu

_HALO = 2  # two stacked k=3, pad=1 convs -> 2-sample halo each side of a chunk


def _rain_kernel(L_total, g_lo_end, g_hi_start, cdt,
                 win_ref, w1e_ref, b1e_ref, a2_ref, c2_ref, pos0_ref,
                 wc2_ref, wl2_ref, bc2_ref, bl2_ref,
                 rate_ref, atten_ref, h_scr):
    rows, TL = rate_ref.shape            # rows == 8 (one sublane group per step)
    H1 = b1e_ref.shape[1]
    W = TL + 2                           # hidden positions [-1, TL] of this chunk

    g = pl.program_id(0)

    xw = win_ref[...]                    # [8, TL+4] f32 streamed halo window
    xw_c = xw.astype(cdt)
    w1e = w1e_ref[...]                   # [8, 3*H1] per-row folded conv1 weights

    # ---- Stage 1a: conv1d(1 -> H1, k=3, pad=1) with FiLM-1 pre-folded ----
    h = xw_c[:, None, 0:W] * w1e[:, 0:H1][:, :, None]
    for k in (1, 2):
        h = h + xw_c[:, None, k:k + W] * w1e[:, k * H1:(k + 1) * H1][:, :, None]
    h = jnp.maximum(h + b1e_ref[...][:, :, None], 0.0)     # [8, H1, W]
    h_scr[...] = h

    # The second conv zero-pads h (pad=1): h must be 0 outside the global
    # range [0, L).  Only groups holding a first-chunk / last-chunk row can be
    # affected, so the masking pass is skipped on all interior groups.
    @pl.when((g < g_lo_end) | (g >= g_hi_start))
    def _():
        pos = pos0_ref[...] + lax.broadcasted_iota(jnp.int32, (rows, W), 1)
        valid = (pos >= 0) & (pos < L_total)                # [8, W]
        h_scr[...] = jnp.where(valid[:, None, :], h_scr[...], 0.0)

    hm = h_scr[...]

    # ---- Stage 1b: conv1d(H1 -> 1, k=3, pad=1) -> baseline (f32 accumulation)
    wc2 = wc2_ref[...]                                      # [3, H1]
    baseline = jnp.zeros((rows, TL), jnp.float32)
    for k in range(3):
        rk = jnp.sum(hm[:, :, k:k + TL] * wc2[k][None, :, None], axis=1)
        baseline = baseline + rk.astype(jnp.float32)
    baseline = baseline + bc2_ref[0]

    x0 = xw[:, _HALO:_HALO + TL]                            # the chunk itself (f32)
    rain_atten = jnp.maximum(x0 - baseline, 0.0)            # f32

    # ---- Stage 2: Linear(1->H2)+FiLM folded into (a2, c2), ReLU, Linear(H2->1), ReLU
    ra = rain_atten.astype(cdt)
    h2 = jnp.maximum(ra[:, None, :] * a2_ref[...][:, :, None]
                     + c2_ref[...][:, :, None], 0.0)        # [8, H2, TL]
    rate = jnp.sum(h2 * wl2_ref[...][:, :, None], axis=1).astype(jnp.float32)
    rate = jnp.maximum(rate + bl2_ref[0], 0.0)

    rate_ref[...] = rate.astype(rate_ref.dtype)
    atten_ref[...] = rain_atten.astype(atten_ref.dtype)


def _pick_chunking(B, L):
    """Choose (chunk_len, n_chunks).

    The sequence is split into chunks (chunk_len a multiple of 128 whenever
    n_chunks > 1); (chunk, batch) pairs become independent rows folded
    8-at-a-time onto sublanes.  Score = useful-element fraction, then prefer
    >=2 grid groups (keeps both v7x TensorCores busy), then larger chunks
    (amortize the ~0.35us per-grid-step overhead)."""
    cands = [(L, 1)]
    for tl in (4096, 2048, 1024, 512, 256, 128):
        if tl < L:
            cands.append((tl, -(-L // tl)))

    def score(cand):
        tl, n = cand
        rows = B * n
        rows_p = -(-rows // 8) * 8
        useful = (B * L) / (rows_p * tl)
        groups = rows_p // 8
        return (useful, 1 if groups >= 2 else 0, tl)

    return max(cands, key=score)


@functools.partial(jax.jit, static_argnames=("compute_dtype",))
def physics_informed_rain_estimation(attenuation_signal, metadata, params,
                                     compute_dtype=jnp.float32):
    """attenuation_signal: [B, 1, L]; metadata: [B, M].
    Returns (estimated_rain_rate [B, 1, L], rain_related_attenuation [B, 1, L])."""
    B, C, L = attenuation_signal.shape
    assert C == 1
    x = attenuation_signal[:, 0, :].astype(jnp.float32)
    meta = metadata.astype(jnp.float32)

    (wbf1, bbf1, wbf2, bbf2, wc1, bc1, wc2, bc2,
     wrf1, brf1, wrf2, brf2, wl1, bl1, wl2, bl2) = [
         p.astype(jnp.float32) for p in params]
    H1 = wc1.shape[1]
    H2 = wl1.shape[1]
    cdt = compute_dtype

    # ---- Hoisted style MLPs (tiny [B, M] matmuls, done once in XLA) ----
    s1 = jax.nn.relu(meta @ wbf1 + bbf1)
    film1 = s1 @ wbf2 + bbf2
    gamma1, beta1 = film1[:, :H1], film1[:, H1:]
    s2 = jax.nn.relu(meta @ wrf1 + brf1)
    film2 = s2 @ wrf2 + brf2
    gamma2, beta2 = film2[:, :H2], film2[:, H2:]

    # Fold FiLM-1 into the first conv: relu(FiLM(conv(x)+bc1)) == relu(conv_w1e(x)+b1e)
    w1e = (gamma1[:, None, :] * wc1[None, :, :]).reshape(B, 3 * H1)   # [B, 3*H1]
    b1e = bc1 * gamma1 + beta1                                        # [B, H1]
    # Fold stage-2 Linear(1->H2) + FiLM:  atten*wl1 + bl1, FiLM  ->  atten*a2 + c2
    a2 = gamma2 * wl1
    c2 = gamma2 * bl1 + beta2

    # ---- Row layout: (chunk, batch) pairs folded 8-at-a-time onto sublanes ----
    TL, n_chunks = _pick_chunking(B, L)
    Lp = TL * n_chunks
    TW = TL + 2 * _HALO
    R = B * n_chunks
    Rp = ((R + 7) // 8) * 8
    n_groups = Rp // 8
    # Static bounds of the groups containing first-chunk / last-chunk rows
    # (rows ordered chunk-major: r = chunk*B + batch).
    g_lo_end = -(-B // 8)
    g_hi_start = ((n_chunks - 1) * B) // 8

    # Per-row halo windows (streamed per 8-row group, never resident as a whole).
    x_pad = jnp.pad(x, ((0, 0), (_HALO, _HALO + Lp - L)))             # [B, Lp+4]
    starts = jnp.arange(n_chunks, dtype=jnp.int32) * TL
    win = jax.vmap(lambda s: lax.dynamic_slice(x_pad, (0, s), (B, TW)))(starts)
    windows = jnp.pad(win.reshape(R, TW), ((0, Rp - R), (0, 0)))      # [Rp, TW]

    def rowify(p, dt):   # [B, F] -> [Rp, F], row r = chunk*B + batch
        t = jnp.tile(p, (n_chunks, 1))
        return jnp.pad(t, ((0, Rp - R), (0, 0))).astype(dt)

    w1e_r = rowify(w1e, cdt)
    b1e_r = rowify(b1e, cdt)
    a2_r = rowify(a2, cdt)
    c2_r = rowify(c2, cdt)
    pos0 = jnp.pad(jnp.repeat(starts - 1, B)[:, None],
                   ((0, Rp - R), (0, 0))).astype(jnp.int32)           # [Rp, 1]

    inputs = [windows, w1e_r, b1e_r, a2_r, c2_r, pos0,
              wc2.astype(cdt), wl2.astype(cdt),
              bc2.reshape(1), bl2.reshape(1)]
    in_specs = [
        pl.BlockSpec((8, TW), lambda g: (g, 0)),            # signal halo windows
        pl.BlockSpec((8, 3 * H1), lambda g: (g, 0)),        # folded conv1 weights
        pl.BlockSpec((8, H1), lambda g: (g, 0)),            # folded conv1 bias
        pl.BlockSpec((8, H2), lambda g: (g, 0)),            # stage-2 scale
        pl.BlockSpec((8, H2), lambda g: (g, 0)),            # stage-2 shift
        pl.BlockSpec((8, 1), lambda g: (g, 0)),             # per-row global offset
        pl.BlockSpec((3, H1), lambda g: (0, 0)),            # conv2 weights (resident)
        pl.BlockSpec((1, H2), lambda g: (0, 0)),            # stage-2 out weights
        pl.BlockSpec(memory_space=pltpu.MemorySpace.SMEM),  # bc2 scalar
        pl.BlockSpec(memory_space=pltpu.MemorySpace.SMEM),  # bl2 scalar
    ]
    out_specs = [pl.BlockSpec((8, TL), lambda g: (g, 0)),
                 pl.BlockSpec((8, TL), lambda g: (g, 0))]

    kernel = functools.partial(_rain_kernel, L, g_lo_end, g_hi_start, cdt)
    rate_rows, atten_rows = pl.pallas_call(
        kernel,
        out_shape=(jax.ShapeDtypeStruct((Rp, TL), jnp.float32),
                   jax.ShapeDtypeStruct((Rp, TL), jnp.float32)),
        grid=(n_groups,),
        in_specs=in_specs,
        out_specs=out_specs,
        scratch_shapes=[pltpu.VMEM((8, H1, TL + 2), cdt)],
        compiler_params=pltpu.CompilerParams(
            dimension_semantics=("parallel",),
            vmem_limit_bytes=32 * 1024 * 1024),
    )(*inputs)

    def unfold(rows_out):
        y = rows_out[:R].reshape(n_chunks, B, TL)
        y = jnp.transpose(y, (1, 0, 2)).reshape(B, Lp)[:, :L]
        return y.reshape(B, 1, L)

    return unfold(rate_rows), unfold(atten_rows)


def reference(attenuation_signal, metadata, params):
    """Pure-JAX reference with identical semantics (for verification)."""
    (wbf1, bbf1, wbf2, bbf2, wc1, bc1, wc2, bc2,
     wrf1, brf1, wrf2, brf2, wl1, bl1, wl2, bl2) = params
    B, _, L = attenuation_signal.shape
    x = attenuation_signal[:, 0, :].astype(jnp.float32)
    meta = metadata.astype(jnp.float32)
    H1 = wc1.shape[1]
    H2 = wl1.shape[1]

    s1 = jax.nn.relu(meta @ wbf1 + bbf1)
    film1 = s1 @ wbf2 + bbf2
    g1, b1 = film1[:, :H1], film1[:, H1:]
    x_pad = jnp.pad(x, ((0, 0), (1, 1)))
    h = sum(x_pad[:, k:k + L][:, :, None] * wc1[k][None, None, :] for k in range(3))
    h = h + bc1[:, None, :]
    h = jax.nn.relu(h * g1[:, None, :] + b1[:, None, :])
    h_pad = jnp.pad(h, ((0, 0), (1, 1), (0, 0)))
    baseline = sum(jnp.sum(h_pad[:, k:k + L, :] * wc2[k][None, None, :], axis=-1)
                   for k in range(3)) + bc2[0, 0]
    rain_atten = jax.nn.relu(x - baseline)

    s2 = jax.nn.relu(meta @ wrf1 + brf1)
    film2 = s2 @ wrf2 + brf2
    g2, be2 = film2[:, :H2], film2[:, H2:]
    h2 = rain_atten[:, :, None] * wl1[:, None, :] + bl1[:, None, :]
    h2 = jax.nn.relu(h2 * g2[:, None, :] + be2[:, None, :])
    rate = jax.nn.relu(jnp.sum(h2 * wl2[:, None, :], axis=-1) + bl2[0, 0])
    return rate.reshape(B, 1, L), rain_atten.reshape(B, 1, L)


def make_params(key, M, S1, S2, H1, H2):
    ks = jax.random.split(key, 16)
    init = lambda k, shape, s: s * jax.random.normal(k, shape, jnp.float32)
    wbf1 = init(ks[0], (M, S1), 0.3)
    bbf1 = init(ks[1], (1, S1), 0.1)
    wbf2 = init(ks[2], (S1, 2 * H1), 0.3)
    bbf2 = init(ks[3], (1, 2 * H1), 0.1) + jnp.concatenate(
        [jnp.ones((1, H1), jnp.float32), jnp.zeros((1, H1), jnp.float32)], axis=1)
    wc1 = init(ks[4], (3, H1), 0.3)
    bc1 = init(ks[5], (1, H1), 0.1)
    wc2 = init(ks[6], (3, H1), 0.3)
    bc2 = init(ks[7], (1, 1), 0.1)
    wrf1 = init(ks[8], (M, S2), 0.3)
    brf1 = init(ks[9], (1, S2), 0.1)
    wrf2 = init(ks[10], (S2, 2 * H2), 0.3)
    brf2 = init(ks[11], (1, 2 * H2), 0.1) + jnp.concatenate(
        [jnp.ones((1, H2), jnp.float32), jnp.zeros((1, H2), jnp.float32)], axis=1)
    wl1 = init(ks[12], (1, H2), 0.3)
    bl1 = init(ks[13], (1, H2), 0.1)
    wl2 = init(ks[14], (1, H2), 0.3)
    bl2 = init(ks[15], (1, 1), 0.1)
    return (wbf1, bbf1, wbf2, bbf2, wc1, bc1, wc2, bc2,
            wrf1, brf1, wrf2, brf2, wl1, bl1, wl2, bl2)


if __name__ == "__main__":
    key = jax.random.PRNGKey(0)
    M, S1, S2, H1, H2 = 6, 8, 8, 8, 16

    k_x, k_m, k_p, k2 = jax.random.split(key, 4)
    params = make_params(k_p, M, S1, S2, H1, H2)

    # Case 1: tiny single-chunk shapes.
    B, L = 2, 16
    sig = jax.random.normal(k_x, (B, 1, L), jnp.float32) + 2.0
    meta = jax.random.normal(k_m, (B, M), jnp.float32)
    rate, atten = physics_informed_rain_estimation(sig, meta, params)
    jax.block_until_ready((rate, atten))
    ref_rate, ref_atten = reference(sig, meta, params)
    assert rate.shape == (B, 1, L) and atten.shape == (B, 1, L)
    assert jnp.allclose(rate, ref_rate, atol=1e-4, rtol=1e-4)
    assert jnp.allclose(atten, ref_atten, atol=1e-4, rtol=1e-4)

    # Case 2: B=3, L=256 -> two 128-sample chunks folded onto sublanes
    # (exercises sublane folding, chunk halos and row padding).
    k_x2, k_m2, k_x3, k_m3 = jax.random.split(k2, 4)
    B2, L2 = 3, 256
    sig2 = jax.random.normal(k_x2, (B2, 1, L2), jnp.float32) + 2.0
    meta2 = jax.random.normal(k_m2, (B2, M), jnp.float32)
    rate2, atten2 = physics_informed_rain_estimation(sig2, meta2, params)
    jax.block_until_ready((rate2, atten2))
    ref_rate2, ref_atten2 = reference(sig2, meta2, params)
    assert jnp.allclose(rate2, ref_rate2, atol=1e-4, rtol=1e-4)
    assert jnp.allclose(atten2, ref_atten2, atol=1e-4, rtol=1e-4)

    # Case 3: L not a multiple of the chunk size, >1 grid group
    # (exercises the gated right-edge mask and the multi-group grid).
    B3, L3 = 2, 600
    sig3 = jax.random.normal(k_x3, (B3, 1, L3), jnp.float32) + 2.0
    meta3 = jax.random.normal(k_m3, (B3, M), jnp.float32)
    rate3, atten3 = physics_informed_rain_estimation(sig3, meta3, params)
    jax.block_until_ready((rate3, atten3))
    ref_rate3, ref_atten3 = reference(sig3, meta3, params)
    assert jnp.allclose(rate3, ref_rate3, atol=1e-4, rtol=1e-4)
    assert jnp.allclose(atten3, ref_atten3, atol=1e-4, rtol=1e-4)

    # Optional packed-bf16 compute path (v6e / v7x only; v5e has no bf16 VPU).
    kind = jax.devices()[0].device_kind.lower()
    if ("v6" in kind) or ("v7" in kind) or ("7x" in kind):
        rate_bf, atten_bf = physics_informed_rain_estimation(
            sig3, meta3, params, compute_dtype=jnp.bfloat16)
        jax.block_until_ready((rate_bf, atten_bf))
        assert jnp.allclose(rate_bf, ref_rate3, atol=5e-1, rtol=1.5e-1)
        assert jnp.allclose(atten_bf, ref_atten3, atol=5e-1, rtol=1.5e-1)

    print("KERNEL_OK")
</pallas_src>

<mosaic_0001>
module attributes {stable_mosaic.version = 11 : i64} {
  func.func @_rain_kernel(%arg0: i32, %arg1: memref<8x20xf32, #tpu.memory_space<vmem>>, %arg2: memref<8x24xf32, #tpu.memory_space<vmem>>, %arg3: memref<8x8xf32, #tpu.memory_space<vmem>>, %arg4: memref<8x16xf32, #tpu.memory_space<vmem>>, %arg5: memref<8x16xf32, #tpu.memory_space<vmem>>, %arg6: memref<8x1xi32, #tpu.memory_space<vmem>>, %arg7: memref<3x8xf32, #tpu.memory_space<vmem>>, %arg8: memref<1x16xf32, #tpu.memory_space<vmem>>, %arg9: memref<1xf32, #tpu.memory_space<smem>>, %arg10: memref<1xf32, #tpu.memory_space<smem>>, %arg11: memref<8x16xf32, #tpu.memory_space<vmem>>, %arg12: memref<8x16xf32, #tpu.memory_space<vmem>>, %arg13: memref<8x8x18xf32, #tpu.memory_space<vmem>>) attributes {dimension_semantics = [#tpu.dimension_semantics<parallel>], iteration_bounds = array<i64: 1>, scalar_prefetch = 0 : i64, scratch_operands = 1 : i64, tpu.core_type = #tpu.core_type<tc>, window_params = [{transform_indices = @transform_0, window_bounds = array<i64: 8, 20>}, {transform_indices = @transform_1, window_bounds = array<i64: 8, 24>}, {transform_indices = @transform_2, window_bounds = array<i64: 8, 8>}, {transform_indices = @transform_3, window_bounds = array<i64: 8, 16>}, {transform_indices = @transform_4, window_bounds = array<i64: 8, 16>}, {transform_indices = @transform_5, window_bounds = array<i64: 8, 1>}, {pipeline_mode = #tpu.pipeline_mode<synchronous>, transform_indices = @transform_6, window_bounds = array<i64: 3, 8>}, {pipeline_mode = #tpu.pipeline_mode<synchronous>, transform_indices = @transform_7, window_bounds = array<i64: 1, 16>}, {transform_indices = @transform_8, window_bounds = array<i64: 1>}, {transform_indices = @transform_9, window_bounds = array<i64: 1>}, {transform_indices = @transform_10, window_bounds = array<i64: 8, 16>}, {transform_indices = @transform_11, window_bounds = array<i64: 8, 16>}]} {
    %c0 = arith.constant 0 : index
    %c0_0 = arith.constant 0 : index
    %0 = vector.load %arg1[%c0, %c0_0] : memref<8x20xf32, #tpu.memory_space<vmem>>, vector<8x20xf32>
    %c0_1 = arith.constant 0 : index
    %c0_2 = arith.constant 0 : index
    %1 = vector.load %arg2[%c0_1, %c0_2] : memref<8x24xf32, #tpu.memory_space<vmem>>, vector<8x24xf32>
    %2 = vector.extract_strided_slice %0 {offsets = [0, 0], sizes = [8, 18], strides = [1, 1]} : vector<8x20xf32> to vector<8x18xf32>
    %3 = vector.shape_cast %2 : vector<8x18xf32> to vector<8x1x18xf32>
    %4 = vector.extract_strided_slice %1 {offsets = [0, 0], sizes = [8, 8], strides = [1, 1]} : vector<8x24xf32> to vector<8x8xf32>
    %5 = vector.shape_cast %4 : vector<8x8xf32> to vector<8x8x1xf32>
    %6 = vector.broadcast %3 : vector<8x1x18xf32> to vector<8x8x18xf32>
    %7 = vector.broadcast %5 : vector<8x8x1xf32> to vector<8x8x18xf32>
    %8 = arith.mulf %6, %7 : vector<8x8x18xf32>
    %9 = vector.extract_strided_slice %0 {offsets = [0, 1], sizes = [8, 18], strides = [1, 1]} : vector<8x20xf32> to vector<8x18xf32>
    %10 = vector.shape_cast %9 : vector<8x18xf32> to vector<8x1x18xf32>
    %11 = vector.extract_strided_slice %1 {offsets = [0, 8], sizes = [8, 8], strides = [1, 1]} : vector<8x24xf32> to vector<8x8xf32>
    %12 = vector.shape_cast %11 : vector<8x8xf32> to vector<8x8x1xf32>
    %13 = vector.broadcast %10 : vector<8x1x18xf32> to vector<8x8x18xf32>
    %14 = vector.broadcast %12 : vector<8x8x1xf32> to vector<8x8x18xf32>
    %15 = arith.mulf %13, %14 : vector<8x8x18xf32>
    %16 = arith.addf %8, %15 : vector<8x8x18xf32>
    %17 = vector.extract_strided_slice %0 {offsets = [0, 2], sizes = [8, 18], strides = [1, 1]} : vector<8x20xf32> to vector<8x18xf32>
    %18 = vector.shape_cast %17 : vector<8x18xf32> to vector<8x1x18xf32>
    %19 = vector.extract_strided_slice %1 {offsets = [0, 16], sizes = [8, 8], strides = [1, 1]} : vector<8x24xf32> to vector<8x8xf32>
    %20 = vector.shape_cast %19 : vector<8x8xf32> to vector<8x8x1xf32>
    %21 = vector.broadcast %18 : vector<8x1x18xf32> to vector<8x8x18xf32>
    %22 = vector.broadcast %20 : vector<8x8x1xf32> to vector<8x8x18xf32>
    %23 = arith.mulf %21, %22 : vector<8x8x18xf32>
    %24 = arith.addf %16, %23 : vector<8x8x18xf32>
    %c0_3 = arith.constant 0 : index
    %c0_4 = arith.constant 0 : index
    %25 = vector.load %arg3[%c0_3, %c0_4] : memref<8x8xf32, #tpu.memory_space<vmem>>, vector<8x8xf32>
    %26 = vector.shape_cast %25 : vector<8x8xf32> to vector<8x8x1xf32>
    %27 = vector.broadcast %26 : vector<8x8x1xf32> to vector<8x8x18xf32>
    %28 = arith.addf %24, %27 : vector<8x8x18xf32>
    %cst = arith.constant 0.000000e+00 : f32
    %29 = vector.broadcast %cst : f32 to vector<8x8x18xf32>
    %30 = arith.maximumf %28, %29 : vector<8x8x18xf32>
    %c0_5 = arith.constant 0 : index
    %c0_6 = arith.constant 0 : index
    %c0_7 = arith.constant 0 : index
    %31 = vector.load %arg13[%c0_5, %c0_6, %c0_7] : memref<8x8x18xf32, #tpu.memory_space<vmem>>, vector<8x8x18xf32>
    tpu.vector_store %arg13[%c0_5, %c0_6, %c0_7], %30 {strides = array<i32>} : memref<8x8x18xf32, #tpu.memory_space<vmem>>, vector<8x8x18xf32>,
    %c1_i32 = arith.constant 1 : i32
    %32 = arith.cmpi slt, %arg0, %c1_i32 : i32
    %c0_i32 = arith.constant 0 : i32
    %33 = arith.cmpi sge, %arg0, %c0_i32 : i32
    %34 = arith.ori %32, %33 : i1
    %35 = arith.extui %34 : i1 to i32
    %c0_i32_8 = arith.constant 0 : i32
    %36 = arith.cmpi ne, %35, %c0_i32_8 : i32
    scf.if %36 {
      %c0_34 = arith.constant 0 : index
      %c0_35 = arith.constant 0 : index
      %95 = vector.load %arg6[%c0_34, %c0_35] : memref<8x1xi32, #tpu.memory_space<vmem>>, vector<8x1xi32>
      %96 = tpu.iota {dimensions = array<i32: 1>} : vector<8x18xi32>
      %97 = vector.broadcast %95 : vector<8x1xi32> to vector<8x18xi32>
      %98 = arith.addi %97, %96 : vector<8x18xi32>
      %c0_i32_36 = arith.constant 0 : i32
      %99 = vector.broadcast %c0_i32_36 : i32 to vector<8x18xi32>
      %100 = arith.cmpi sge, %98, %99 : vector<8x18xi32>
      %c16_i32 = arith.constant 16 : i32
      %101 = vector.broadcast %c16_i32 : i32 to vector<8x18xi32>
      %102 = arith.cmpi slt, %98, %101 : vector<8x18xi32>
      %103 = arith.andi %100, %102 : vector<8x18xi1>
      %104 = vector.shape_cast %103 : vector<8x18xi1> to vector<8x1x18xi1>
      %c0_37 = arith.constant 0 : index
      %c0_38 = arith.constant 0 : index
      %c0_39 = arith.constant 0 : index
      %105 = vector.load %arg13[%c0_37, %c0_38, %c0_39] : memref<8x8x18xf32, #tpu.memory_space<vmem>>, vector<8x8x18xf32>
      %cst_40 = arith.constant 0.000000e+00 : f32
      %106 = vector.shape_cast %104 : vector<8x1x18xi1> to vector<8x1x18xi1>
      %107 = vector.broadcast %106 : vector<8x1x18xi1> to vector<8x8x18xi1>
      %108 = vector.broadcast %cst_40 : f32 to vector<8x8x18xf32>
      %109 = arith.select %107, %105, %108 : vector<8x8x18xi1>, vector<8x8x18xf32>
      %c0_41 = arith.constant 0 : index
      %c0_42 = arith.constant 0 : index
      %c0_43 = arith.constant 0 : index
      %110 = vector.load %arg13[%c0_41, %c0_42, %c0_43] : memref<8x8x18xf32, #tpu.memory_space<vmem>>, vector<8x8x18xf32>
      tpu.vector_store %arg13[%c0_41, %c0_42, %c0_43], %109 {strides = array<i32>} : memref<8x8x18xf32, #tpu.memory_space<vmem>>, vector<8x8x18xf32>,
    } else {
    }
    %c0_9 = arith.constant 0 : index
    %c0_10 = arith.constant 0 : index
    %c0_11 = arith.constant 0 : index
    %37 = vector.load %arg13[%c0_9, %c0_10, %c0_11] : memref<8x8x18xf32, #tpu.memory_space<vmem>>, vector<8x8x18xf32>
    %c0_12 = arith.constant 0 : index
    %c0_13 = arith.constant 0 : index
    %38 = vector.load %arg7[%c0_12, %c0_13] : memref<3x8xf32, #tpu.memory_space<vmem>>, vector<3x8xf32>
    %cst_14 = arith.constant 0.000000e+00 : f32
    %39 = vector.broadcast %cst_14 : f32 to vector<8x16xf32>
    %40 = vector.extract_strided_slice %37 {offsets = [0, 0, 0], sizes = [8, 8, 16], strides = [1, 1, 1]} : vector<8x8x18xf32> to vector<8x8x16xf32>
    %41 = vector.extract_strided_slice %38 {offsets = [0, 0], sizes = [1, 8], strides = [1, 1]} : vector<3x8xf32> to vector<1x8xf32>
    %42 = vector.shape_cast %41 : vector<1x8xf32> to vector<8xf32>
    %43 = vector.shape_cast %42 : vector<8xf32> to vector<1x8x1xf32>
    %44 = vector.broadcast %43 : vector<1x8x1xf32> to vector<8x8x16xf32>
    %45 = arith.mulf %40, %44 : vector<8x8x16xf32>
    %cst_15 = arith.constant dense<0.000000e+00> : vector<8x16xf32>
    %46 = vector.multi_reduction <add>, %45, %cst_15 [1] : vector<8x8x16xf32> to vector<8x16xf32>
    %47 = arith.addf %39, %46 : vector<8x16xf32>
    %48 = vector.extract_strided_slice %37 {offsets = [0, 0, 1], sizes = [8, 8, 16], strides = [1, 1, 1]} : vector<8x8x18xf32> to vector<8x8x16xf32>
    %49 = vector.extract_strided_slice %38 {offsets = [1, 0], sizes = [1, 8], strides = [1, 1]} : vector<3x8xf32> to vector<1x8xf32>
    %50 = vector.shape_cast %49 : vector<1x8xf32> to vector<8xf32>
    %51 = vector.shape_cast %50 : vector<8xf32> to vector<1x8x1xf32>
    %52 = vector.broadcast %51 : vector<1x8x1xf32> to vector<8x8x16xf32>
    %53 = arith.mulf %48, %52 : vector<8x8x16xf32>
    %cst_16 = arith.constant dense<0.000000e+00> : vector<8x16xf32>
    %54 = vector.multi_reduction <add>, %53, %cst_16 [1] : vector<8x8x16xf32> to vector<8x16xf32>
    %55 = arith.addf %47, %54 : vector<8x16xf32>
    %56 = vector.extract_strided_slice %37 {offsets = [0, 0, 2], sizes = [8, 8, 16], strides = [1, 1, 1]} : vector<8x8x18xf32> to vector<8x8x16xf32>
    %57 = vector.extract_strided_slice %38 {offsets = [2, 0], sizes = [1, 8], strides = [1, 1]} : vector<3x8xf32> to vector<1x8xf32>
    %58 = vector.shape_cast %57 : vector<1x8xf32> to vector<8xf32>
    %59 = vector.shape_cast %58 : vector<8xf32> to vector<1x8x1xf32>
    %60 = vector.broadcast %59 : vector<1x8x1xf32> to vector<8x8x16xf32>
    %61 = arith.mulf %56, %60 : vector<8x8x16xf32>
    %cst_17 = arith.constant dense<0.000000e+00> : vector<8x16xf32>
    %62 = vector.multi_reduction <add>, %61, %cst_17 [1] : vector<8x8x16xf32> to vector<8x16xf32>
    %63 = arith.addf %55, %62 : vector<8x16xf32>
    %c0_18 = arith.constant 0 : index
    %64 = memref.load %arg9[%c0_18] : memref<1xf32, #tpu.memory_space<smem>>
    %65 = vector.broadcast %64 : f32 to vector<8x16xf32>
    %66 = arith.addf %63, %65 : vector<8x16xf32>
    %67 = vector.extract_strided_slice %0 {offsets = [0, 2], sizes = [8, 16], strides = [1, 1]} : vector<8x20xf32> to vector<8x16xf32>
    %68 = arith.subf %67, %66 : vector<8x16xf32>
    %cst_19 = arith.constant 0.000000e+00 : f32
    %69 = vector.broadcast %cst_19 : f32 to vector<8x16xf32>
    %70 = arith.maximumf %68, %69 : vector<8x16xf32>
    %71 = vector.shape_cast %70 : vector<8x16xf32> to vector<8x1x16xf32>
    %c0_20 = arith.constant 0 : index
    %c0_21 = arith.constant 0 : index
    %72 = vector.load %arg4[%c0_20, %c0_21] : memref<8x16xf32, #tpu.memory_space<vmem>>, vector<8x16xf32>
    %73 = vector.shape_cast %72 : vector<8x16xf32> to vector<8x16x1xf32>
    %74 = vector.broadcast %71 : vector<8x1x16xf32> to vector<8x16x16xf32>
    %75 = vector.broadcast %73 : vector<8x16x1xf32> to vector<8x16x16xf32>
    %76 = arith.mulf %74, %75 : vector<8x16x16xf32>
    %c0_22 = arith.constant 0 : index
    %c0_23 = arith.constant 0 : index
    %77 = vector.load %arg5[%c0_22, %c0_23] : memref<8x16xf32, #tpu.memory_space<vmem>>, vector<8x16xf32>
    %78 = vector.shape_cast %77 : vector<8x16xf32> to vector<8x16x1xf32>
    %79 = vector.broadcast %78 : vector<8x16x1xf32> to vector<8x16x16xf32>
    %80 = arith.addf %76, %79 : vector<8x16x16xf32>
    %cst_24 = arith.constant 0.000000e+00 : f32
    %81 = vector.broadcast %cst_24 : f32 to vector<8x16x16xf32>
    %82 = arith.maximumf %80, %81 : vector<8x16x16xf32>
    %c0_25 = arith.constant 0 : index
    %c0_26 = arith.constant 0 : index
    %83 = vector.load %arg8[%c0_25, %c0_26] : memref<1x16xf32, #tpu.memory_space<vmem>>, vector<1x16xf32>
    %84 = vector.shape_cast %83 : vector<1x16xf32> to vector<1x16x1xf32>
    %85 = vector.broadcast %84 : vector<1x16x1xf32> to vector<8x16x16xf32>
    %86 = arith.mulf %82, %85 : vector<8x16x16xf32>
    %cst_27 = arith.constant dense<0.000000e+00> : vector<8x16xf32>
    %87 = vector.multi_reduction <add>, %86, %cst_27 [1] : vector<8x16x16xf32> to vector<8x16xf32>
    %c0_28 = arith.constant 0 : index
    %88 = memref.load %arg10[%c0_28] : memref<1xf32, #tpu.memory_space<smem>>
    %89 = vector.broadcast %88 : f32 to vector<8x16xf32>
    %90 = arith.addf %87, %89 : vector<8x16xf32>
    %cst_29 = arith.constant 0.000000e+00 : f32
    %91 = vector.broadcast %cst_29 : f32 to vector<8x16xf32>
    %92 = arith.maximumf %90, %91 : vector<8x16xf32>
    %c0_30 = arith.constant 0 : index
    %c0_31 = arith.constant 0 : index
    %93 = vector.load %arg11[%c0_30, %c0_31] : memref<8x16xf32, #tpu.memory_space<vmem>>, vector<8x16xf32>
    tpu.vector_store %arg11[%c0_30, %c0_31], %92 {strides = array<i32>} : memref<8x16xf32, #tpu.memory_space<vmem>>, vector<8x16xf32>,
    %c0_32 = arith.constant 0 : index
    %c0_33 = arith.constant 0 : index
    %94 = vector.load %arg12[%c0_32, %c0_33] : memref<8x16xf32, #tpu.memory_space<vmem>>, vector<8x16xf32>
    tpu.vector_store %arg12[%c0_32, %c0_33], %70 {strides = array<i32>} : memref<8x16xf32, #tpu.memory_space<vmem>>, vector<8x16xf32>,
    return
  }
  func.func @transform_0(%arg0: i32) -> (i32, i32) {
    %c0_i32 = arith.constant 0 : i32
    %c0_i32_0 = arith.constant 0 : i32
    return %arg0, %c0_i32 : i32, i32
  }
  func.func @transform_1(%arg0: i32) -> (i32, i32) {
    %c0_i32 = arith.constant 0 : i32
    %c0_i32_0 = arith.constant 0 : i32
    return %arg0, %c0_i32 : i32, i32
  }
  func.func @transform_2(%arg0: i32) -> (i32, i32) {
    %c0_i32 = arith.constant 0 : i32
    %c0_i32_0 = arith.constant 0 : i32
    return %arg0, %c0_i32 : i32, i32
  }
  func.func @transform_3(%arg0: i32) -> (i32, i32) {
    %c0_i32 = arith.constant 0 : i32
    %c0_i32_0 = arith.constant 0 : i32
    return %arg0, %c0_i32 : i32, i32
  }
  func.func @transform_4(%arg0: i32) -> (i32, i32) {
    %c0_i32 = arith.constant 0 : i32
    %c0_i32_0 = arith.constant 0 : i32
    return %arg0, %c0_i32 : i32, i32
  }
  func.func @transform_5(%arg0: i32) -> (i32, i32) {
    %c0_i32 = arith.constant 0 : i32
    %c0_i32_0 = arith.constant 0 : i32
    return %arg0, %c0_i32 : i32, i32
  }
  func.func @transform_6(%arg0: i32) -> (i32, i32) {
    %c0_i32 = arith.constant 0 : i32
    %c0_i32_0 = arith.constant 0 : i32
    %c0_i32_1 = arith.constant 0 : i32
    return %c0_i32, %c0_i32_0 : i32, i32
  }
  func.func @transform_7(%arg0: i32) -> (i32, i32) {
    %c0_i32 = arith.constant 0 : i32
    %c0_i32_0 = arith.constant 0 : i32
    %c0_i32_1 = arith.constant 0 : i32
    return %c0_i32, %c0_i32_0 : i32, i32
  }
  func.func @transform_8(%arg0: i32) -> i32 {
    %c0_i32 = arith.constant 0 : i32
    %c0_i32_0 = arith.constant 0 : i32
    return %c0_i32 : i32
  }
  func.func @transform_9(%arg0: i32) -> i32 {
    %c0_i32 = arith.constant 0 : i32
    %c0_i32_0 = arith.constant 0 : i32
    return %c0_i32 : i32
  }
  func.func @transform_10(%arg0: i32) -> (i32, i32) {
    %c0_i32 = arith.constant 0 : i32
    %c0_i32_0 = arith.constant 0 : i32
    return %arg0, %c0_i32 : i32, i32
  }
  func.func @transform_11(%arg0: i32) -> (i32, i32) {
    %c0_i32 = arith.constant 0 : i32
    %c0_i32_0 = arith.constant 0 : i32
    return %arg0, %c0_i32 : i32, i32
  }
}

</mosaic_0001>

<bundles_post_ra>
// kernel: physics_informed_rain_estimation.1
= control target key start
LH: loop header
LB: loop body
LE: loop exit
PB: predicated region body
PF: predicated region fallthrough
CT: control target
= control target key end

     0   :  { %v46_v0 = vlaneseq  ;;  %v1414_v1 = vmov 0   ;;  %v1415_v28 = vmov 1966171168   ;;  %s1416_s22 = smov 127   ;;  %s1417_s23 = smov 126   ;;  %vm428_vm5 = vcmask 146432   ;;  %s1977_s1 = inlined_call_operand.vmem [shape: f32[8,24], index: 1, kind: input, shape index: {}]   ;;  %s1978_s5 = inlined_call_operand.vmem [shape: s32[8,1], index: 5, kind: input, shape index: {}]   ;;  %s1979_s2 = inlined_call_operand.vmem [shape: f32[8,8], index: 2, kind: input, shape index: {}]   ;;  %s1980_s0 = inlined_call_operand.vmem [shape: f32[8,20], index: 0, kind: input, shape index: {}]   ;;  %s1981_s6 = inlined_call_operand.vmem [shape: f32[3,8], index: 6, kind: input, shape index: {}]   ;;  %s1982_s3 = inlined_call_operand.vmem [shape: f32[8,16], index: 3, kind: input, shape index: {}]   ;;  %s1983_s4 = inlined_call_operand.vmem [shape: f32[8,16], index: 4, kind: input, shape index: {}]   ;;  %s1984_s7 = inlined_call_operand.vmem [shape: f32[1,16], index: 7, kind: input, shape index: {}]   ;;  %s1985_s8 = inlined_call_operand.<no memory space> [shape: f32[1], index: 8, kind: input, shape index: {}]   ;;  %s1986_s9 = inlined_call_operand.<no memory space> [shape: f32[1], index: 9, kind: input, shape index: {}]   ;;  %s1987_s11 = inlined_call_operand.vmem [shape: f32[8,16], index: 11, kind: output, shape index: {1}]   ;;  %s1988_s10 = inlined_call_operand.vmem [shape: f32[8,16], index: 10, kind: output, shape index: {0}]  }
   0x1   :  { %1411 = vset.pattern.permute.xlu0 %v1414_v1  ;;  %v40_v3 = vld [vmem:[%s1977_s1] sm:$0xff]  ;;  %v44_v29 = vunpack.c.l.s4 %v1415_v28  ;;  %vm799_vm15 = vcmask 146448  }
   0x2   :  { %v1481_v2 = vshrl.u32 %v46_v0, 7  ;;  %v443_v20 = vld [vmem:[%s1978_s5] sm:$0xff] }
   0x3   :  { %v1524_v21 = vld [vmem:[%s1979_s2] sm:$0xff]  ;;  %v45_v30 = vunpack.c.0.s8 %v44_v29 }
   0x4   :  { %v1487_v4 = vsub.s32 0, %v1481_v2  ;;  %v1490_v5 = vsub.s32 1, %v1481_v2  ;;  %v1493_v6 = vsub.s32 2, %v1481_v2  ;;  %v1496_v7 = vsub.s32 3, %v1481_v2  ;;  %v39_v32 = vld [vmem:[%s1980_s0] sm:$0xff] }
   0x5   :  { %v1503_v12 = vsub.s32 4, %v1481_v2  ;;  %v1507_v14 = vsub.s32 5, %v1481_v2  ;;  %v1511_v16 = vsub.s32 6, %v1481_v2  ;;  %v1515_v18 = vsub.s32 7, %v1481_v2 }
   0x6   :  { %v101_v8 = vrot.slane %v40_v3, %v1490_v5  ;;  %v94_v9 = vrot.slane %v40_v3, %v1487_v4  ;;  %v108_v10 = vrot.slane %v40_v3, %v1493_v6  ;;  %v115_v11 = vrot.slane %v40_v3, %v1496_v7 }
   0x7   :  { %v122_v13 = vrot.slane %v40_v3, %v1503_v12  ;;  %v129_v15 = vrot.slane %v40_v3, %v1507_v14  ;;  %v136_v17 = vrot.slane %v40_v3, %v1511_v16  ;;  %v143_v19 = vrot.slane %v40_v3, %v1515_v18 }
   0x8   :  { %201 = vbcast.lane.b32.xlu0 %v101_v8, 264  ;;  %197 = vbcast.lane.b32.xlu1 %v94_v9, 264  ;;  %v366_v22 = vrot.slane %v1524_v21, %v1490_v5  ;;  %v359_v23 = vrot.slane %v1524_v21, %v1487_v4  ;;  %v373_v24 = vrot.slane %v1524_v21, %v1493_v6 }
   0x9   :  { %v380_v25 = vrot.slane %v1524_v21, %v1496_v7  ;;  %v387_v26 = vrot.slane %v1524_v21, %v1503_v12  ;;  %v394_v27 = vrot.slane %v1524_v21, %v1507_v14  ;;  %v1539_v31 = vsub.s32 %v45_v30, %v1481_v2 }
   0xa   :  { %v42_v40 = vcombine.high %v39_v32, %v39_v32 }
   0xb   :  { %v49_v33 = vrot.slane %v39_v32, %v1539_v31  ;;  %v408_v32 = vrot.slane %v1524_v21, %v1515_v18 }
   0xc   :  { %205 = vbcast.lane.b32.xlu0 %v108_v10, 264  ;;  %209 = vbcast.lane.b32.xlu1 %v115_v11, 264  ;;  %v56_v46 = vrot.slane %v42_v40, %v1539_v31 }
   0xd   :  { %v57_v34 = vcombine.high %v49_v33, %v49_v33  ;;  %v65_v36 = vrot.slane %v49_v33, %v1539_v31 }
   0xe   :  { %v58_v47 = vcombine.high %v56_v46, %v56_v46  ;;  %v72_v57 = vrot.slane %v56_v46, %v1539_v31 }
   0xf   :  { %v79_v35 = vrot.slane %v57_v34, %v1539_v31  ;;  %v87_v38 = vcombine.high %v65_v36, %v65_v36  ;;  %v1560_v50 = vrot.slane %v65_v36, %v1487_v4  ;;  %v591_v34 = vld [vmem:[%s1981_s6] sm:$0x7] }
  0x10   :  { %281 = vbcast.lane.b32.xlu0 %v101_v8, 272  ;;  %213 = vbcast.lane.b32.xlu1 %v122_v13, 264  ;;  %v86_v53 = vrot.slane %v58_v47, %v1539_v31  ;;  %v1576_v63 = vrot.slane %v72_v57, %v1487_v4  ;;  %v88_v2 = vcombine.high %v72_v57, %v72_v57 }
  0x11   :  { %v1548_v37 = vrot.slane %v79_v35, %v1487_v4  ;;  %v89_v39 = vcombine.high %v79_v35, %v79_v35  ;;  %v1552_v44 = vrot.slane %v87_v38, %v1487_v4  ;;  %v787_v36 = vrot.slane %v591_v34, %v1493_v6 }
  0x12   :  { %v1572_v59 = vrot.slane %v86_v53, %v1487_v4  ;;  %v401_v38 = vrot.slane %v1524_v21, %v1511_v16  ;;  %v595_v40 = vrot.slane %v591_v34, %v1487_v4 }
  0x13   :  { %v1555_v45 = vrot.slane %v89_v39, %v1487_v4  ;;  %v675_v39 = vrot.slane %v591_v34, %v1490_v5 }
  0x14   :  { %285 = vbcast.lane.b32.xlu0 %v108_v10, 272  ;;  %217 = vbcast.lane.b32.xlu1 %v129_v15, 264 }
  0x18   :  { %277 = vbcast.lane.b32.xlu0 %v94_v9, 272  ;;  %289 = vbcast.lane.b32.xlu1 %v115_v11, 272 }
  0x1c   :  { %221 = vbcast.lane.b32.xlu0 %v136_v17, 264  ;;  %293 = vbcast.lane.b32.xlu1 %v122_v13, 272 }
  0x20   :  { %225 = vbcast.lane.b32.xlu0 %v143_v19, 264  ;;  %297 = vbcast.lane.b32.xlu1 %v129_v15, 272 }
  0x24   :  { %301 = vbcast.lane.b32.xlu0 %v136_v17, 272  ;;  %305 = vbcast.lane.b32.xlu1 %v143_v19, 272 }
  0x28   :  { %103 = vbcast.lane.b32.xlu1 %v101_v8, 256  ;;  %447 = vperm.xlu0 %1411, %v443_v20  }
  0x2c   :  { %110 = vbcast.lane.b32.xlu1 %v108_v10, 256  ;;  %96 = vbcast.lane.b32.xlu0 %v94_v9, 256 }
  0x30   :  { %117 = vbcast.lane.b32.xlu1 %v115_v11, 256  ;;  %145 = vbcast.lane.b32.xlu0 %v143_v19, 256  ;;  %v1583_v11 = vrot.slane %v88_v2, %v1487_v4 }
  0x34   :  { %124 = vbcast.lane.b32.xlu1 %v122_v13, 256  ;;  %368 = vbcast.lane.b32.xlu0 %v366_v22, 256 }
  0x38   :  { %131 = vbcast.lane.b32.xlu1 %v129_v15, 256  ;;  %361 = vbcast.lane.b32.xlu0 %v359_v23, 256 }
  0x3c   :  { %138 = vbcast.lane.b32.xlu1 %v136_v17, 256  ;;  %v90_v17 = vcombine.high %v86_v53, %v86_v53  ;;  %v445_v53 = vand.u32 127, %v46_v0 }
  0x40   :  { %375 = vbcast.lane.b32.xlu1 %v373_v24, 256  ;;  %v1594_v24 = vrot.slane %v90_v17, %v1487_v4 }
  0x44   :  { %382 = vbcast.lane.b32.xlu1 %v380_v25, 256 }
  0x48   :  { %389 = vbcast.lane.b32.xlu1 %v387_v26, 256 }
  0x4c   :  { %396 = vbcast.lane.b32.xlu1 %v394_v27, 256 }
  0x7a   :  { %v202_v41 = vpop.permute.xlu0 %201  ;;  %v198_v42 = vpop.permute.xlu1 %197 }
  0x7b   :  { %v228_v43 = vmul.f32 %v202_v41, %v1548_v37  ;;  %v227_v56 = vmul.f32 %v198_v42, %v1560_v50 }
  0x7d   :  { %245 = vrot.lane.b32.xlu0 %v228_v43, %s1416_s22 }
  0x7e   :  { %v206_v48 = vpop.permute.xlu0 %205  ;;  %v210_v49 = vpop.permute.xlu1 %209 }
  0x7f   :  { %v229_v51 = vmul.f32 %v206_v48, %v1552_v44  ;;  %v230_v52 = vmul.f32 %v210_v49, %v1555_v45 }
  0x81   :  { %247 = vrot.lane.b32.xlu0 %v229_v51, %s1416_s22  ;;  %249 = vrot.lane.b32.xlu1 %v230_v52, %s1416_s22 }
  0x82   :  { %v282_v54 = vpop.permute.xlu0 %281  ;;  %v214_v55 = vpop.permute.xlu1 %213 }
  0x83   :  { %v308_v58 = vmul.f32 %v282_v54, %v1548_v37  ;;  %v231_v10 = vmul.f32 %v214_v55, %v1576_v63 }
  0x85   :  { %243 = vrot.lane.b32.xlu0 %v227_v56, %s1416_s22 }
  0x86   :  { %v286_v60 = vpop.permute.xlu0 %285  ;;  %v218_v61 = vpop.permute.xlu1 %217 }
  0x87   :  { %v309_v62 = vmul.f32 %v286_v60, %v1552_v44  ;;  %v232_v3 = vmul.f32 %v218_v61, %v1572_v59 }
  0x89   :  { %325 = vrot.lane.b32.xlu0 %v308_v58, %s1417_s23  ;;  %327 = vrot.lane.b32.xlu1 %v309_v62, %s1417_s23 }
  0x8a   :  { %v278_v8 = vpop.permute.xlu0 %277  ;;  %v290_v9 = vpop.permute.xlu1 %289 }
  0x8b   :  { %v307_v13 = vmul.f32 %v278_v8, %v1560_v50  ;;  %v310_v15 = vmul.f32 %v290_v9, %v1555_v45 }
  0x8d   :  { %251 = vrot.lane.b32.xlu0 %v231_v10, %s1416_s22  ;;  %253 = vrot.lane.b32.xlu1 %v232_v3, %s1416_s22 }
  0x8e   :  { %v222_v19 = vpop.permute.xlu0 %221  ;;  %v294_v20 = vpop.permute.xlu1 %293 }
  0x8f   :  { %v233_v22 = vmul.f32 %v222_v19, %v1583_v11  ;;  %v311_v23 = vmul.f32 %v294_v20, %v1576_v63 }
  0x91   :  { %323 = vrot.lane.b32.xlu0 %v307_v13, %s1417_s23  ;;  %329 = vrot.lane.b32.xlu1 %v310_v15, %s1417_s23 }
  0x92   :  { %v226_v25 = vpop.permute.xlu0 %225  ;;  %v298_v26 = vpop.permute.xlu1 %297 }
  0x93   :  { %v234_v27 = vmul.f32 %v226_v25, %v1594_v24  ;;  %v312_v28 = vmul.f32 %v298_v26, %v1572_v59 }
  0x95   :  { %331 = vrot.lane.b32.xlu0 %v311_v23, %s1417_s23  ;;  %255 = vrot.lane.b32.xlu1 %v233_v22, %s1416_s22 }
  0x96   :  { %v302_v29 = vpop.permute.xlu0 %301  ;;  %v306_v33 = vpop.permute.xlu1 %305 }
  0x97   :  { %v313_v30 = vmul.f32 %v302_v29, %v1583_v11  ;;  %v314_v35 = vmul.f32 %v306_v33, %v1594_v24 }
  0x99   :  { %333 = vrot.lane.b32.xlu1 %v312_v28, %s1417_s23  ;;  %257 = vrot.lane.b32.xlu0 %v234_v27, %s1416_s22 }
  0x9a   :  { %v104_v41 = vpop.permute.xlu1 %103 }
  0x9b   :  { %v188_v13 = vmul.f32 %v1548_v37, %v104_v41 }
  0x9d   :  { %410 = vbcast.lane.b32.xlu1 %v408_v32, 256  ;;  %335 = vrot.lane.b32.xlu0 %v313_v30, %s1417_s23 }
  0x9e   :  { %v111_v42 = vpop.permute.xlu1 %110 }
  0x9f   :  { %v189_v15 = vmul.f32 %v1552_v44, %v111_v42 }
  0xa1   :  { %789 = vbcast.lane.b32.xlu1 %v787_v36, 256  ;;  %337 = vrot.lane.b32.xlu0 %v314_v35, %s1417_s23 }
  0xa2   :  { %v118_v43 = vpop.permute.xlu1 %117 }
  0xa3   :  { %v190_v32 = vmul.f32 %v1555_v45, %v118_v43 }
  0xa5   :  { %403 = vbcast.lane.b32.xlu0 %v401_v38, 256 }
  0xa6   :  { %v125_v46 = vpop.permute.xlu1 %124 }
  0xa7   :  { %v448_v47 = vpop.permute.xlu0 %447 }
  0xa8   :  { %v449_v56 = vadd.s32 %v448_v47, %v445_v53  ;;  %v191_v47 = vmul.f32 %v1576_v63, %v125_v46 }
  0xa9   :  { %677 = vbcast.lane.b32.xlu0 %v675_v39, 256 }
  0xaa   :  { %v1616_v48 = vpop.permute.xlu1 %131  ;;  %vm450_vm0 = vcmp.ge.s32.totalorder %v449_v56, 0  ;;  %vm451_vm1 = vcmp.lt.s32.totalorder %v449_v56, 16 }
  0xab   :  { %v97_v49 = vpop.permute.xlu0 %96  ;;  %vm452_vm2 = vmand %vm450_vm0, %vm451_vm1 }
  0xac   :  { %v453_v61 = vsel %vm452_vm2, 1, %v1414_v1  ;;  %v187_v34 = vmul.f32 %v1560_v50, %v97_v49 }
  0xad   :  { %597 = vbcast.lane.b32.xlu0 %v595_v40, 256  ;;  %v461_v2 = vrot.slane %v453_v61, %v1539_v31  ;;  %v454_v26 = vcombine.high %v453_v61, %v453_v61 }
  0xae   :  { %v1618_v51 = vpop.permute.xlu1 %138 }
  0xaf   :  { %v1620_v52 = vpop.permute.xlu0 %145  ;;  %v469_v8 = vcombine.high %v461_v2, %v461_v2  ;;  %v477_v0 = vrot.slane %v461_v2, %v1539_v31  ;;  %v468_v44 = vrot.slane %v454_v26, %v1539_v31 }
  0xb1   :  { %v491_v20 = vrot.slane %v469_v8, %v1539_v31  ;;  %v499_v22 = vcombine.high %v477_v0, %v477_v0  ;;  %vm503_vm6 = vcmp.ne.s32.totalorder %v477_v0, 0  ;;  %v484_v2 = vrot.slane %v468_v44, %v1539_v31 }
  0xb2   :  { %v376_v21 = vpop.permute.xlu1 %375 }
  0xb3   :  { %v369_v54 = vpop.permute.xlu0 %368  ;;  %vm504_vm3 = vcmp.ne.s32.totalorder %v491_v20, 0  ;;  %vm505_vm4 = vcmp.ne.s32.totalorder %v499_v22, 0  ;;  %v501_v38 = vcombine.high %v491_v20, %v491_v20  ;;  %vm507_vm10 = vcmp.ne.s32.totalorder %v484_v2, 0 }
  0xb4   :  { %v520_v39 = vsel %vm504_vm3, 1, %v1414_v1  ;;  %v521_v40 = vsel %vm505_vm4, 1, %v1414_v1  ;;  %vm687_vm3 = vcmask 138248  }
  0xb5   :  { %v534_v49 = vrot.slane %v520_v39, %v1487_v4  ;;  %vm506_vm7 = vcmp.ne.s32.totalorder %v501_v38, 0 }
  0xb6   :  { %v383_v55 = vpop.permute.xlu1 %382 }
  0xb7   :  { %v362_v57 = vpop.permute.xlu0 %361  ;;  %vm560_vm9 = vcmp.eq.s32.totalorder %v534_v49, 1 }
  0xba   :  { %v1623_v58 = vpop.permute.xlu1 %389 }
  0xbe   :  { %v1626_v62 = vpop.permute.xlu1 %396 }
  0xef   :  { %v246_v60 = vpop.permute.xlu0 %245 }
  0xf0   :  { %v268_v17 = vadd.f32 %v246_v60, %v188_v13  ;;  %v519_v13 = vsel %vm503_vm6, 1, %v1414_v1 }
  0xf1   :  { %v530_v26 = vrot.slane %v519_v13, %v1487_v4 }
  0xf3   :  { %v248_v3 = vpop.permute.xlu0 %247  ;;  %v250_v9 = vpop.permute.xlu1 %249  ;;  %vm559_vm12 = vcmp.eq.s32.totalorder %v530_v26, 1 }
  0xf4   :  { %v269_v19 = vadd.f32 %v248_v3, %v189_v15  ;;  %v270_v41 = vadd.f32 %v250_v9, %v190_v32  ;;  %v192_v3 = vmul.f32 %v1572_v59, %v1616_v48  ;;  %v522_v15 = vsel %vm506_vm7, 1, %v1414_v1 }
  0xf5   :  { %vm915_vm7 = vcmask 1041409  }
  0xf7   :  { %v244_v10 = vpop.permute.xlu0 %243 }
  0xf8   :  { %v267_v42 = vadd.f32 %v244_v10, %v187_v34 }
  0xfb   :  { %v326_v23 = vpop.permute.xlu0 %325  ;;  %v328_v25 = vpop.permute.xlu1 %327 }
  0xfc   :  { %v348_v27 = vadd.f32 %v326_v23, %v268_v17  ;;  %v349_v28 = vadd.f32 %v328_v25, %v269_v19 }
  0xfe   :  { %v413_v29 = vadd.f32 %v369_v54, %v348_v27  ;;  %v414_v30 = vadd.f32 %v376_v21, %v349_v28  ;;  %v470_v21 = vcombine.high %v468_v44, %v468_v44  ;;  %v538_v54 = vrot.slane %v521_v40, %v1487_v4 }
  0xff   :  { %v252_v37 = vpop.permute.xlu0 %251  ;;  %v254_v33 = vpop.permute.xlu1 %253  ;;  %v542_v27 = vrot.slane %v522_v15, %v1487_v4  ;;  %v194_v44 = vmul.f32 %v1594_v24, %v1620_v52 }
 0x100   :  { %v421_v35 = vmax.f32 %v413_v29, 0.0  ;;  %v422_v36 = vmax.f32 %v414_v30, 0.0  ;;  %v271_v56 = vadd.f32 %v252_v37, %v191_v47  ;;  %v498_v63 = vrot.slane %v470_v21, %v1539_v31 }
 0x101   :  { %vm561_vm8 = vcmp.eq.s32.totalorder %v538_v54, 1  ;;  %v272_v20 = vadd.f32 %v254_v33, %v192_v3  ;;  %v523_v29 = vsel %vm507_vm10, 1, %v1414_v1  ;;  %v500_v37 = vcombine.high %v484_v2, %v484_v2 }
 0x102   :  { %430 = vst.msk [vmem:[#allocation2 + $0x8] sm:$0xff] %vm428_vm5, %v421_v35  ;;  %431 = vst.msk [vmem:[#allocation2 + $0x10] sm:$0xff] %vm428_vm5, %v422_v36  ;;  %v502_v28 = vcombine.high %v498_v63, %v498_v63  ;;  %vm508_vm11 = vcmp.ne.s32.totalorder %v498_v63, 0  ;;  %v193_v33 = vmul.f32 %v1583_v11, %v1618_v51  ;;  %v546_v36 = vrot.slane %v523_v29, %v1487_v4 }
 0x103   :  { %v324_v45 = vpop.permute.xlu0 %323  ;;  %v330_v43 = vpop.permute.xlu1 %329  ;;  %v524_v35 = vsel %vm508_vm11, 1, %v1414_v1  ;;  %vm562_vm13 = vcmp.eq.s32.totalorder %v542_v27, 1  ;;  %vm1678_vm0 = vcmp.ne.s32.totalorder %v500_v37, 0  ;;  %vm924_vm10 = vcmask 1044484  }
 0x104   :  { %v347_v53 = vadd.f32 %v324_v45, %v267_v42  ;;  %v350_v50 = vadd.f32 %v330_v43, %v270_v41  ;;  %vm1665_vm14 = vcmp.ne.s32.totalorder %v502_v28, 0  ;;  %vm563_vm1 = vcmp.eq.s32.totalorder %v546_v36, 1 }
 0x105   :  { %v550_v54 = vrot.slane %v524_v35, %v1487_v4  ;;  %vm927_vm11 = vcmask 1045509  }
 0x106   :  { %v412_v60 = vadd.f32 %v362_v57, %v347_v53  ;;  %v415_v61 = vadd.f32 %v383_v55, %v350_v50  ;;  %v526_v50 = vsel %vm1665_vm14, 1, %v1414_v1 }
 0x107   :  { %v332_v8 = vpop.permute.xlu0 %331  ;;  %v256_v9 = vpop.permute.xlu1 %255  ;;  %vm564_vm2 = vcmp.eq.s32.totalorder %v550_v54, 1  ;;  %v558_v15 = vrot.slane %v526_v50, %v1487_v4 }
 0x108   :  { %v420_v46 = vmax.f32 %v412_v60, 0.0  ;;  %v423_v10 = vmax.f32 %v415_v61, 0.0  ;;  %v351_v0 = vadd.f32 %v332_v8, %v271_v56  ;;  %v273_v52 = vadd.f32 %v256_v9, %v193_v33 }
 0x109   :  { %v512_v57 = vld [vmem:[#allocation2 + $0x8] sm:$0xff]  ;;  %v513_v55 = vld [vmem:[#allocation2 + $0x10] sm:$0xff]  ;;  %vm1717_vm4 = vcmp.eq.s32.totalorder %v558_v15, 1 }
 0x10a   :  { %v568_v17 = vsel %vm560_vm9, %v512_v57, 0.0  ;;  %v569_v19 = vsel %vm561_vm8, %v513_v55, 0.0  ;;  %429 = vst.msk [vmem:[#allocation2] sm:$0xff] %vm428_vm5, %v420_v46  ;;  %432 = vst.msk [vmem:[#allocation2 + $0x18] sm:$0xff] %vm428_vm5, %v423_v10  ;;  %v416_v59 = vadd.f32 %v1623_v58, %v351_v0  ;;  %v525_v46 = vsel %vm1678_vm0, 1, %v1414_v1 }
 0x10b   :  { %576 = vst.msk [vmem:[#allocation2 + $0x8] sm:$0xff] %vm428_vm5, %v568_v17  ;;  %577 = vst.msk [vmem:[#allocation2 + $0x10] sm:$0xff] %vm428_vm5, %v569_v19  ;;  %v334_v48 = vpop.permute.xlu1 %333  ;;  %v258_v22 = vpop.permute.xlu0 %257  ;;  %v554_v1 = vrot.slane %v525_v46, %v1487_v4  ;;  %vm918_vm8 = vcmask 1042434   ;;  %vm921_vm9 = vcmask 1043459  }
 0x10c   :  { %v424_v23 = vmax.f32 %v416_v59, 0.0  ;;  %v352_v25 = vadd.f32 %v334_v48, %v272_v20  ;;  %v274_v11 = vadd.f32 %v258_v22, %v194_v44 }
 0x10d   :  { %vm1730_vm6 = vcmp.eq.s32.totalorder %v554_v1, 1 }
 0x10e   :  { %433 = vst.msk [vmem:[#allocation2 + $0x20] sm:$0xff] %vm428_vm5, %v424_v23  ;;  %v417_v58 = vadd.f32 %v1626_v62, %v352_v25 }
 0x10f   :  { %v411_v30 = vpop.permute.xlu1 %410  ;;  %v336_v32 = vpop.permute.xlu0 %335 }
 0x110   :  { %v425_v34 = vmax.f32 %v417_v58, 0.0  ;;  %v353_v56 = vadd.f32 %v336_v32, %v273_v52 }
 0x111   :  { %v511_v38 = vld [vmem:[#allocation2] sm:$0xff]  ;;  %v514_v39 = vld [vmem:[#allocation2 + $0x18] sm:$0xff] }
 0x112   :  { %v567_v40 = vsel %vm559_vm12, %v511_v38, 0.0  ;;  %v570_v41 = vsel %vm562_vm13, %v514_v39, 0.0  ;;  %434 = vst.msk [vmem:[#allocation2 + $0x28] sm:$0xff] %vm428_vm5, %v425_v34  ;;  %v1670_v51 = vld [vmem:[#allocation2 + $0x10] sm:$0xff]  ;;  %v1672_v24 = vld [vmem:[#allocation2 + $0x8] sm:$0xff]  ;;  %vm930_vm12 = vcmask 1046534  }
 0x113   :  { %575 = vst.msk [vmem:[#allocation2] sm:$0xff] %vm428_vm5, %v567_v40  ;;  %578 = vst.msk [vmem:[#allocation2 + $0x18] sm:$0xff] %vm428_vm5, %v570_v41  ;;  %v1676_v42 = vpop.permute.xlu1 %789  ;;  %v338_v45 = vpop.permute.xlu0 %337  ;;  %vm933_vm13 = vcmask 1047559  }
 0x114   :  { %v354_v47 = vadd.f32 %v338_v45, %v274_v11  ;;  %v792_v21 = vmul.f32 %v1676_v42, %v1672_v24  ;;  %v793_v53 = vmul.f32 %v1676_v42, %v1670_v51 }
 0x115   :  { %v515_v49 = vld [vmem:[#allocation2 + $0x20] sm:$0xff] }
 0x116   :  { %v571_v60 = vsel %vm563_vm1, %v515_v49, 0.0  ;;  %v419_v61 = vadd.f32 %v411_v30, %v354_v47  ;;  %v807_v2 = vsel %vm799_vm15, %v792_v21, 0.0  ;;  %v814_v3 = vsel %vm799_vm15, %v793_v53, 0.0 }
 0x117   :  { %579 = vst.msk [vmem:[#allocation2 + $0x20] sm:$0xff] %vm428_vm5, %v571_v60  ;;  %v404_v8 = vpop.permute.xlu0 %403  ;;  %v808_v9 = vrot.slane %v807_v2, 4  ;;  %v815_v63 = vrot.slane %v814_v3, 4 }
 0x118   :  { %v427_v10 = vmax.f32 %v419_v61, 0.0  ;;  %v418_v0 = vadd.f32 %v404_v8, %v353_v56 }
 0x119   :  { %v516_v13 = vld [vmem:[#allocation2 + $0x28] sm:$0xff]  ;;  %v809_v57 = vadd.f32 %v808_v9, %v807_v2  ;;  %v816_v22 = vadd.f32 %v815_v63, %v814_v3 }
 0x11a   :  { %v572_v55 = vsel %vm564_vm2, %v516_v13, 0.0  ;;  %436 = vst.msk [vmem:[#allocation2 + $0x38] sm:$0xff] %vm428_vm5, %v427_v10  ;;  %v426_v17 = vmax.f32 %v418_v0, 0.0  ;;  %v1698_v19 = vld [vmem:[#allocation2 + $0x18] sm:$0xff]  ;;  %v1700_v20 = vld [vmem:[#allocation2] sm:$0xff] }
 0x11b   :  { %580 = vst.msk [vmem:[#allocation2 + $0x28] sm:$0xff] %vm428_vm5, %v572_v55  ;;  %v1704_v59 = vpop.permute.xlu0 %677  ;;  %v810_v48 = vrot.slane %v809_v57, 2  ;;  %v794_v23 = vmul.f32 %v1676_v42, %v1698_v19  ;;  %v791_v30 = vmul.f32 %v1676_v42, %v1700_v20  ;;  %v817_v11 = vrot.slane %v816_v22, 2 }
 0x11c   :  { %435 = vst.msk [vmem:[#allocation2 + $0x30] sm:$0xff] %vm428_vm5, %v426_v17  ;;  %v681_v25 = vmul.f32 %v1704_v59, %v1670_v51  ;;  %v680_v26 = vmul.f32 %v1704_v59, %v1672_v24  ;;  %v682_v27 = vmul.f32 %v1704_v59, %v1698_v19  ;;  %v679_v28 = vmul.f32 %v1704_v59, %v1700_v20 }
 0x11d   :  { %v821_v58 = vsel %vm799_vm15, %v794_v23, 0.0  ;;  %v811_v41 = vadd.f32 %v810_v48, %v809_v57  ;;  %v800_v56 = vsel %vm799_vm15, %v791_v30, 0.0 }
 0x11e   :  { %v702_v32 = vsel %vm687_vm3, %v681_v25, 0.0  ;;  %v695_v37 = vsel %vm687_vm3, %v680_v26, 0.0  ;;  %v709_v33 = vsel %vm687_vm3, %v682_v27, 0.0  ;;  %v688_v44 = vsel %vm687_vm3, %v679_v28, 0.0  ;;  %v1728_v34 = vld [vmem:[#allocation2 + $0x20] sm:$0xff] }
 0x11f   :  { %v703_v35 = vrot.slane %v702_v32, 4  ;;  %v696_v36 = vrot.slane %v695_v37, 4  ;;  %v710_v38 = vrot.slane %v709_v33, 4  ;;  %v689_v39 = vrot.slane %v688_v44, 4 }
 0x120   :  { %v683_v40 = vmul.f32 %v1704_v59, %v1728_v34  ;;  %v822_v54 = vrot.slane %v821_v58, 4  ;;  %v812_v46 = vrot.slane %v811_v41, 1  ;;  %v801_v48 = vrot.slane %v800_v56, 4 }
 0x121   :  { %v518_v52 = vld [vmem:[#allocation2 + $0x38] sm:$0xff]  ;;  %v704_v45 = vadd.f32 %v703_v35, %v702_v32  ;;  %v697_v43 = vadd.f32 %v696_v36, %v695_v37  ;;  %v711_v47 = vadd.f32 %v710_v38, %v709_v33  ;;  %v690_v21 = vadd.f32 %v689_v39, %v688_v44 }
 0x122   :  { %v574_v53 = vsel %vm1717_vm4, %v518_v52, 0.0  ;;  %v716_v50 = vsel %vm687_vm3, %v683_v40, 0.0  ;;  %v1739_v49 = vld [vmem:[#allocation2 + $0x28] sm:$0xff]  ;;  %v823_v1 = vadd.f32 %v822_v54, %v821_v58  ;;  %v818_v27 = vadd.f32 %v817_v11, %v816_v22 }
 0x123   :  { %582 = vst.msk [vmem:[#allocation2 + $0x38] sm:$0xff] %vm428_vm5, %v574_v53  ;;  %v517_v60 = vld [vmem:[#allocation2 + $0x30] sm:$0xff]  ;;  %v705_v61 = vrot.slane %v704_v45, 2  ;;  %v698_v2 = vrot.slane %v697_v43, 2  ;;  %v712_v3 = vrot.slane %v711_v47, 2  ;;  %v691_v8 = vrot.slane %v690_v21, 2 }
 0x124   :  { %v573_v9 = vsel %vm1730_vm6, %v517_v60, 0.0  ;;  %v717_v63 = vrot.slane %v716_v50, 4  ;;  %v684_v10 = vmul.f32 %v1704_v59, %v1739_v49  ;;  %v802_v32 = vadd.f32 %v801_v48, %v800_v56 }
 0x125   :  { %581 = vst.msk [vmem:[#allocation2 + $0x30] sm:$0xff] %vm428_vm5, %v573_v9  ;;  %v706_v0 = vadd.f32 %v705_v61, %v704_v45  ;;  %v699_v13 = vadd.f32 %v698_v2, %v697_v43  ;;  %v713_v15 = vadd.f32 %v712_v3, %v711_v47  ;;  %v692_v57 = vadd.f32 %v691_v8, %v690_v21 }
 0x126   :  { %v718_v55 = vadd.f32 %v717_v63, %v716_v50  ;;  %v723_v17 = vsel %vm687_vm3, %v684_v10, 0.0  ;;  %v813_v44 = vadd.f32 %v812_v46, %v811_v41  ;;  %v824_v38 = vrot.slane %v823_v1, 2 }
 0x127   :  { %v707_v23 = vrot.slane %v706_v0, 1  ;;  %v700_v25 = vrot.slane %v699_v13, 1  ;;  %v714_v26 = vrot.slane %v713_v15, 1  ;;  %v693_v28 = vrot.slane %v692_v57, 1 }
 0x128   :  { %v719_v29 = vrot.slane %v718_v55, 2  ;;  %v724_v30 = vrot.slane %v723_v17, 4  ;;  %v803_v39 = vrot.slane %v802_v32, 2  ;;  %v819_v58 = vrot.slane %v818_v27, 1 }
 0x129   :  { %v708_v37 = vadd.f32 %v707_v23, %v706_v0  ;;  %v701_v33 = vadd.f32 %v700_v25, %v699_v13  ;;  %v795_v22 = vmul.f32 %v1676_v42, %v1728_v34  ;;  %v796_v40 = vmul.f32 %v1676_v42, %v1739_v49 }
 0x12a   :  { %v720_v35 = vadd.f32 %v719_v29, %v718_v55  ;;  %v725_v36 = vadd.f32 %v724_v30, %v723_v17  ;;  %v1749_v62 = vld [vmem:[#allocation2 + $0x38] sm:$0xff]  ;;  %v715_v11 = vadd.f32 %v714_v26, %v713_v15  ;;  %v694_v52 = vadd.f32 %v693_v28, %v692_v57 }
 0x12b   :  { %756 = vrot.lane.b32.xlu0 %v708_v37, %s1416_s22  ;;  %754 = vrot.lane.b32.xlu1 %v701_v33, %s1416_s22  ;;  %v686_v41 = vmul.f32 %v1704_v59, %v1749_v62  ;;  %v828_v21 = vsel %vm799_vm15, %v795_v22, 0.0  ;;  %v835_v50 = vsel %vm799_vm15, %v796_v40, 0.0  ;;  %v825_v60 = vadd.f32 %v824_v38, %v823_v1 }
 0x12c   :  { %v721_v45 = vrot.slane %v720_v35, 1  ;;  %v726_v43 = vrot.slane %v725_v36, 2  ;;  %v1759_v47 = vld [vmem:[#allocation2 + $0x30] sm:$0xff]  ;;  %v804_v61 = vadd.f32 %v803_v39, %v802_v32  ;;  %v829_v2 = vrot.slane %v828_v21, 4 }
 0x12d   :  { %v685_v53 = vmul.f32 %v1704_v59, %v1759_v47  ;;  %v737_v54 = vsel %vm687_vm3, %v686_v41, 0.0  ;;  %v836_v8 = vrot.slane %v835_v50, 4  ;;  %v798_v63 = vmul.f32 %v1676_v42, %v1749_v62 }
 0x12e   :  { %v727_v56 = vadd.f32 %v726_v43, %v725_v36  ;;  %v738_v9 = vrot.slane %v737_v54, 4  ;;  %v722_v59 = vadd.f32 %v721_v45, %v720_v35  ;;  %v830_v10 = vadd.f32 %v829_v2, %v828_v21  ;;  %v990_v2 = vld [vmem:[%s1982_s3] sm:$0xff] }
 0x12f   :  { %758 = vrot.lane.b32.xlu0 %v715_v11, %s1416_s22  ;;  %752 = vrot.lane.b32.xlu1 %v694_v52, %s1416_s22  ;;  %v730_v3 = vsel %vm687_vm3, %v685_v53, 0.0  ;;  %v837_v13 = vadd.f32 %v836_v8, %v835_v50  ;;  %v849_v57 = vsel %vm799_vm15, %v798_v63, 0.0  ;;  %v797_v55 = vmul.f32 %v1676_v42, %v1759_v47 }
 0x130   :  { %v728_v46 = vrot.slane %v727_v56, 1  ;;  %v731_v0 = vrot.slane %v730_v3, 4  ;;  %v739_v15 = vadd.f32 %v738_v9, %v737_v54  ;;  %v831_v17 = vrot.slane %v830_v10, 2 }
 0x131   :  { %v850_v48 = vrot.slane %v849_v57, 4  ;;  %v826_v23 = vrot.slane %v825_v60, 1  ;;  %v805_v25 = vrot.slane %v804_v61, 1  ;;  %v842_v26 = vsel %vm799_vm15, %v797_v55, 0.0 }
 0x132   :  { %v732_v1 = vadd.f32 %v731_v0, %v730_v3  ;;  %v838_v29 = vrot.slane %v837_v13, 2  ;;  %v740_v30 = vrot.slane %v739_v15, 2  ;;  %v843_v32 = vrot.slane %v842_v26, 4 }
 0x133   :  { %760 = vrot.lane.b32.xlu0 %v722_v59, %s1416_s22  ;;  %866 = vrot.lane.b32.xlu1 %v813_v44, %s1417_s23  ;;  %v729_v37 = vadd.f32 %v728_v46, %v727_v56  ;;  %v820_v33 = vadd.f32 %v819_v58, %v818_v27  ;;  %v832_v35 = vadd.f32 %v831_v17, %v830_v10  ;;  %v1135_v10 = vld [vmem:[%s1983_s4] sm:$0xff]  ;;  %vm607_vm5 = vcmask 130048  }
 0x134   :  { %v733_v28 = vrot.slane %v732_v1, 2  ;;  %v851_v36 = vadd.f32 %v850_v48, %v849_v57  ;;  %v844_v38 = vadd.f32 %v843_v32, %v842_v26  ;;  %v827_v39 = vadd.f32 %v826_v23, %v825_v60  ;;  %v598_v23 = vpop.permute.xlu0 %597 }
 0x135   :  { %v806_v44 = vadd.f32 %v805_v25, %v804_v61  ;;  %v839_v22 = vadd.f32 %v838_v29, %v837_v13  ;;  %v741_v40 = vadd.f32 %v740_v30, %v739_v15  ;;  %v833_v41 = vrot.slane %v832_v35, 1 }
 0x136   :  { %v734_v42 = vadd.f32 %v733_v28, %v732_v1  ;;  %v852_v52 = vrot.slane %v851_v36, 2  ;;  %v845_v45 = vrot.slane %v844_v38, 2  ;;  %v994_v9 = vrot.slane %v990_v2, %v1487_v4 }
 0x137   :  { %762 = vrot.lane.b32.xlu0 %v729_v37, %s1416_s22  ;;  %868 = vrot.lane.b32.xlu1 %v820_v33, %s1417_s23  ;;  %v840_v27 = vrot.slane %v839_v22, 1  ;;  %v742_v58 = vrot.slane %v741_v40, 1  ;;  %v834_v43 = vadd.f32 %v833_v41, %v832_v35  ;;  %v1005_v63 = vrot.slane %v990_v2, %v1490_v5 }
 0x138   :  { %v735_v11 = vrot.slane %v734_v42, 1  ;;  %v853_v53 = vadd.f32 %v852_v52, %v851_v36  ;;  %v846_v50 = vadd.f32 %v845_v45, %v844_v38  ;;  %v1016_v59 = vrot.slane %v990_v2, %v1493_v6 }
 0x139   :  { %v841_v54 = vadd.f32 %v840_v27, %v839_v22  ;;  %v743_v56 = vadd.f32 %v742_v58, %v741_v40  ;;  %v1027_v46 = vrot.slane %v990_v2, %v1496_v7  ;;  %v1139_v0 = vrot.slane %v1135_v10, %v1487_v4 }
 0x13a   :  { %v736_v21 = vadd.f32 %v735_v11, %v734_v42  ;;  %v854_v60 = vrot.slane %v853_v53, 1  ;;  %v847_v61 = vrot.slane %v846_v50, 1  ;;  %v1150_v13 = vrot.slane %v1135_v10, %v1490_v5 }
 0x13b   :  { %870 = vrot.lane.b32.xlu0 %v827_v39, %s1417_s23  ;;  %864 = vrot.lane.b32.xlu1 %v806_v44, %s1417_s23  ;;  %v1038_v15 = vrot.slane %v990_v2, %v1503_v12  ;;  %v1161_v57 = vrot.slane %v1135_v10, %v1493_v6  ;;  %v1049_v55 = vrot.slane %v990_v2, %v1507_v14 }
 0x13c   :  { %v855_v3 = vadd.f32 %v854_v60, %v853_v53  ;;  %v848_v8 = vadd.f32 %v847_v61, %v846_v50  ;;  %v1172_v17 = vrot.slane %v1135_v10, %v1496_v7  ;;  %v1060_v5 = vrot.slane %v990_v2, %v1511_v16  ;;  %v1816_v7 = vld [vmem:[%s1984_s7] ss:$0 sm:$0xff] }
 0x13d   :  { %v1183_v1 = vrot.slane %v1135_v10, %v1503_v12  ;;  %v1806_v6 = vrot.slane %v990_v2, %v1515_v18  ;;  %v1810_v48 = vrot.slane %v1135_v10, %v1507_v14  ;;  %v1820_v12 = vrot.slane %v1135_v10, %v1511_v16 }
 0x13e   :  { %v1824_v25 = vrot.slane %v1135_v10, %v1515_v18  ;;  %v600_v14 = vmul.f32 %v598_v23, %v1672_v24  ;;  %v601_v26 = vmul.f32 %v598_v23, %v1670_v51  ;;  %v599_v16 = vmul.f32 %v598_v23, %v1700_v20 }
 0x13f   :  { %872 = vrot.lane.b32.xlu0 %v834_v43, %s1417_s23  ;;  %764 = vrot.lane.b32.xlu1 %v736_v21, %s1416_s22  ;;  %v602_v30 = vmul.f32 %v598_v23, %v1698_v19  ;;  %v603_v18 = vmul.f32 %v598_v23, %v1728_v34  ;;  %v604_v39 = vmul.f32 %v598_v23, %v1739_v49 }
 0x140   :  { %v615_v28 = vsel %vm607_vm5, %v600_v14, 0.0  ;;  %v622_v29 = vsel %vm607_vm5, %v601_v26, 0.0  ;;  %v608_v33 = vsel %vm607_vm5, %v599_v16, 0.0  ;;  %v605_v34 = vmul.f32 %v598_v23, %v1759_v47 }
 0x141   :  { %v616_v32 = vrot.slane %v615_v28, 4  ;;  %v623_v37 = vrot.slane %v622_v29, 4  ;;  %v629_v24 = vsel %vm607_vm5, %v602_v30, 0.0  ;;  %v609_v36 = vrot.slane %v608_v33, 4 }
 0x142   :  { %v630_v42 = vrot.slane %v629_v24, 4  ;;  %v636_v38 = vsel %vm607_vm5, %v603_v18, 0.0  ;;  %v643_v41 = vsel %vm607_vm5, %v604_v39, 0.0  ;;  %v606_v11 = vmul.f32 %v598_v23, %v1749_v62 }
 0x143   :  { %874 = vrot.lane.b32.xlu0 %v841_v54, %s1417_s23  ;;  %766 = vrot.lane.b32.xlu1 %v743_v56, %s1416_s22  ;;  %v617_v35 = vadd.f32 %v616_v32, %v615_v28  ;;  %v624_v51 = vadd.f32 %v623_v37, %v622_v29  ;;  %v637_v22 = vrot.slane %v636_v38, 4  ;;  %v610_v19 = vadd.f32 %v609_v36, %v608_v33 }
 0x144   :  { %v631_v40 = vadd.f32 %v630_v42, %v629_v24  ;;  %v644_v21 = vrot.slane %v643_v41, 4  ;;  %v650_v49 = vsel %vm607_vm5, %v605_v34, 0.0  ;;  %v657_v54 = vsel %vm607_vm5, %v606_v11, 0.0 }
 0x145   :  { %v618_v44 = vrot.slane %v617_v35, 2  ;;  %v625_v20 = vrot.slane %v624_v51, 2  ;;  %v638_v43 = vadd.f32 %v637_v22, %v636_v38  ;;  %v611_v53 = vrot.slane %v610_v19, 2 }
 0x146   :  { %v632_v50 = vrot.slane %v631_v40, 2  ;;  %v645_v47 = vadd.f32 %v644_v21, %v643_v41  ;;  %v897_v26 = vstv %s1985_s8  ;;  %s1418_s8 = smov 2  }
 0x147   :  { %878 = vrot.lane.b32.xlu0 %v855_v3, %s1417_s23  ;;  %876 = vrot.lane.b32.xlu1 %v848_v8, %s1417_s23  ;;  %v619_v52 = vadd.f32 %v618_v44, %v617_v35  ;;  %v626_v27 = vadd.f32 %v625_v20, %v624_v51  ;;  %v639_v3 = vrot.slane %v638_v43, 2  ;;  %v651_v8 = vrot.slane %v650_v49, 4 }
 0x148   :  { %v612_v62 = vadd.f32 %v611_v53, %v610_v19 }
 0x149   :  { %v620_v56 = vrot.slane %v619_v52, 1  ;;  %v627_v60 = vrot.slane %v626_v27, 1 }
 0x14b   :  { %1000 = vbcast.lane.b32.xlu1 %v994_v9, 264  ;;  %996 = vbcast.lane.b32.xlu0 %v994_v9, 256  ;;  %v633_v9 = vadd.f32 %v632_v50, %v631_v40 }
 0x14f   :  { %1011 = vbcast.lane.b32.xlu1 %v1005_v63, 264  ;;  %1007 = vbcast.lane.b32.xlu0 %v1005_v63, 256  ;;  %v658_v63 = vrot.slane %v657_v54, 4 }
 0x153   :  { %1022 = vbcast.lane.b32.xlu1 %v1016_v59, 264  ;;  %1018 = vbcast.lane.b32.xlu0 %v1016_v59, 256  ;;  %v621_v59 = vadd.f32 %v620_v56, %v619_v52 }
 0x157   :  { %1033 = vbcast.lane.b32.xlu1 %v1027_v46, 264  ;;  %1029 = vbcast.lane.b32.xlu0 %v1027_v46, 256  ;;  %v628_v46 = vadd.f32 %v627_v60, %v626_v27 }
 0x15b   :  { %1145 = vbcast.lane.b32.xlu1 %v1139_v0, 264  ;;  %1141 = vbcast.lane.b32.xlu0 %v1139_v0, 256  ;;  %v640_v0 = vadd.f32 %v639_v3, %v638_v43 }
 0x15d   :  { %v641_v28 = vrot.slane %v640_v0, 1 }
 0x15f   :  { %1156 = vbcast.lane.b32.xlu1 %v1150_v13, 264  ;;  %1152 = vbcast.lane.b32.xlu0 %v1150_v13, 256  ;;  %v642_v22 = vadd.f32 %v641_v28, %v640_v0 }
 0x163   :  { %1044 = vbcast.lane.b32.xlu1 %v1038_v15, 264  ;;  %1040 = vbcast.lane.b32.xlu0 %v1038_v15, 256  ;;  %v646_v15 = vrot.slane %v645_v47, 2 }
 0x165   :  { %v647_v16 = vadd.f32 %v646_v15, %v645_v47 }
 0x167   :  { %1167 = vbcast.lane.b32.xlu1 %v1161_v57, 264  ;;  %1163 = vbcast.lane.b32.xlu0 %v1161_v57, 256  ;;  %v652_v57 = vadd.f32 %v651_v8, %v650_v49  ;;  %v648_v38 = vrot.slane %v647_v16, 1 }
 0x169   :  { %v653_v32 = vrot.slane %v652_v57, 2 }
 0x16b   :  { %1055 = vbcast.lane.b32.xlu1 %v1049_v55, 264  ;;  %1051 = vbcast.lane.b32.xlu0 %v1049_v55, 256  ;;  %v654_v20 = vadd.f32 %v653_v32, %v652_v57 }
 0x16d   :  { %v655_v21 = vrot.slane %v654_v20, 1 }
 0x16f   :  { %1178 = vbcast.lane.b32.xlu1 %v1172_v17, 264  ;;  %1174 = vbcast.lane.b32.xlu0 %v1172_v17, 256  ;;  %v613_v17 = vrot.slane %v612_v62, 1 }
 0x171   :  { %v614_v37 = vadd.f32 %v613_v17, %v612_v62  ;;  %v656_v62 = vadd.f32 %v655_v21, %v654_v20 }
 0x173   :  { %1066 = vbcast.lane.b32.xlu1 %v1060_v5, 264  ;;  %1062 = vbcast.lane.b32.xlu0 %v1060_v5, 256  ;;  %v634_v5 = vrot.slane %v633_v9, 1 }
 0x175   :  { %v635_v18 = vadd.f32 %v634_v5, %v633_v9 }
 0x177   :  { %1189 = vbcast.lane.b32.xlu1 %v1183_v1, 264  ;;  %1185 = vbcast.lane.b32.xlu0 %v1183_v1, 256  ;;  %v659_v1 = vadd.f32 %v658_v63, %v657_v54 }
 0x179   :  { %v660_v24 = vrot.slane %v659_v1, 2 }
 0x17b   :  { %1073 = vbcast.lane.b32.xlu0 %v1806_v6, 256  ;;  %v661_v41 = vadd.f32 %v660_v24, %v659_v1 }
 0x17d   :  { %v662_v56 = vrot.slane %v661_v41, 1 }
 0x17f   :  { %1196 = vbcast.lane.b32.xlu0 %v1810_v48, 256 }
 0x183   :  { %1262 = vbcast.lane.b32.xlu0 %v1816_v7, 256 }
 0x187   :  { %1207 = vbcast.lane.b32.xlu0 %v1820_v12, 256 }
 0x18b   :  { %1218 = vbcast.lane.b32.xlu0 %v1824_v25, 256 }
 0x19d   :  { %v755_v45 = vpop.permute.xlu1 %754  ;;  %v757_v58 = vpop.permute.xlu0 %756 }
 0x19e   :  { %v777_v55 = vadd.f32 %v755_v45, %v621_v59  ;;  %v778_v23 = vadd.f32 %v757_v58, %v628_v46  ;;  %v649_v58 = vadd.f32 %v648_v38, %v647_v16  ;;  %v663_v59 = vadd.f32 %v662_v56, %v661_v41 }
 0x1a1   :  { %v753_v61 = vpop.permute.xlu1 %752  ;;  %v759_v2 = vpop.permute.xlu0 %758 }
 0x1a2   :  { %v776_v35 = vadd.f32 %v753_v61, %v614_v37  ;;  %v779_v51 = vadd.f32 %v759_v2, %v635_v18 }
 0x1a5   :  { %v867_v10 = vpop.permute.xlu1 %866  ;;  %v761_v13 = vpop.permute.xlu0 %760 }
 0x1a6   :  { %v889_v14 = vadd.f32 %v867_v10, %v777_v55  ;;  %v780_v11 = vadd.f32 %v761_v13, %v642_v22 }
 0x1a8   :  { %v899_v36 = vadd.f32 %v897_v26, %v889_v14 }
 0x1a9   :  { %v869_v29 = vpop.permute.xlu1 %868  ;;  %v763_v30 = vpop.permute.xlu0 %762 }
 0x1aa   :  { %v890_v33 = vadd.f32 %v869_v29, %v778_v23  ;;  %v914_v34 = vrot.slane %v899_v36, 7  ;;  %v781_v61 = vadd.f32 %v763_v30, %v649_v58 }
 0x1ac   :  { %v900_v42 = vadd.f32 %v897_v26, %v890_v33 }
 0x1ad   :  { %v865_v39 = vpop.permute.xlu1 %864  ;;  %v871_v44 = vpop.permute.xlu0 %870 }
 0x1ae   :  { %v888_v19 = vadd.f32 %v865_v39, %v776_v35  ;;  %v891_v40 = vadd.f32 %v871_v44, %v779_v51  ;;  %v917_v27 = vrot.slane %v900_v42, 6 }
 0x1b0   :  { %v898_v52 = vadd.f32 %v897_v26, %v888_v19  ;;  %v901_v45 = vadd.f32 %v897_v26, %v891_v40 }
 0x1b1   :  { %v765_v43 = vpop.permute.xlu1 %764  ;;  %v873_v53 = vpop.permute.xlu0 %872 }
 0x1b2   :  { %v916_v50 = vsel %vm915_vm7, %v914_v34, %v898_v52  ;;  %v920_v49 = vrot.slane %v901_v45, 5  ;;  %v892_v54 = vadd.f32 %v873_v53, %v780_v11  ;;  %v782_v46 = vadd.f32 %v765_v43, %v656_v62  ;;  %v1413_v52 = vld [vmem:[%s1980_s0] sm:$0xff] }
 0x1b3   :  { %v919_v60 = vsel %vm918_vm8, %v917_v27, %v916_v50 }
 0x1b4   :  { %v922_v2 = vsel %vm921_vm9, %v920_v49, %v919_v60  ;;  %v902_v3 = vadd.f32 %v897_v26, %v892_v54 }
 0x1b5   :  { %v875_v47 = vpop.permute.xlu0 %874  ;;  %v767_v8 = vpop.permute.xlu1 %766 }
 0x1b6   :  { %v923_v9 = vrot.slane %v902_v3, 4  ;;  %v893_v63 = vadd.f32 %v875_v47, %v781_v61  ;;  %v783_v13 = vadd.f32 %v767_v8, %v663_v59  ;;  %v1889_v8 = vstv %s1986_s9 }
 0x1b8   :  { %v925_v10 = vsel %vm924_vm10, %v923_v9, %v922_v2  ;;  %v903_v0 = vadd.f32 %v897_v26, %v893_v63 }
 0x1b9   :  { %v879_v15 = vpop.permute.xlu0 %878  ;;  %v877_v57 = vpop.permute.xlu1 %876 }
 0x1ba   :  { %v926_v55 = vrot.slane %v903_v0, 3  ;;  %v895_v17 = vadd.f32 %v879_v15, %v783_v13  ;;  %v894_v5 = vadd.f32 %v877_v57, %v782_v46 }
 0x1bc   :  { %v905_v1 = vadd.f32 %v897_v26, %v895_v17  ;;  %v904_v23 = vadd.f32 %v897_v26, %v894_v5  ;;  %v928_v14 = vsel %vm927_vm11, %v926_v55, %v925_v10 }
 0x1bd   :  { %v1001_v26 = vpop.permute.xlu1 %1000  ;;  %v997_v32 = vpop.permute.xlu0 %996 }
 0x1be   :  { %v932_v28 = vrot.slane %v905_v1, 1  ;;  %v929_v29 = vrot.slane %v904_v23, 2 }
 0x1c0   :  { %v931_v16 = vsel %vm930_vm12, %v929_v29, %v928_v14 }
 0x1c1   :  { %v934_v30 = vsel %vm933_vm13, %v932_v28, %v931_v16  ;;  %v1012_v37 = vpop.permute.xlu1 %1011  ;;  %v1008_v18 = vpop.permute.xlu0 %1007 }
 0x1c2   :  { %935 = vrot.lane.b32.xlu1 %v934_v30, %s1418_s8 }
 0x1c5   :  { %v1023_v33 = vpop.permute.xlu1 %1022  ;;  %v1019_v24 = vpop.permute.xlu0 %1018 }
 0x1c6   :  { %1077 = vbcast.lane.b32.xlu1 %v1806_v6, 264 }
 0x1c9   :  { %v1034_v35 = vpop.permute.xlu1 %1033  ;;  %v1030_v51 = vpop.permute.xlu0 %1029 }
 0x1ca   :  { %1200 = vbcast.lane.b32.xlu1 %v1810_v48, 264 }
 0x1cd   :  { %v1146_v36 = vpop.permute.xlu1 %1145  ;;  %v1142_v42 = vpop.permute.xlu0 %1141 }
 0x1ce   :  { %1266 = vbcast.lane.b32.xlu1 %v1816_v7, 264 }
 0x1d1   :  { %v1157_v38 = vpop.permute.xlu1 %1156  ;;  %v1153_v6 = vpop.permute.xlu0 %1152 }
 0x1d2   :  { %1211 = vbcast.lane.b32.xlu1 %v1820_v12, 264 }
 0x1d5   :  { %v1858_v39 = vpop.permute.xlu1 %1044  ;;  %v1860_v48 = vpop.permute.xlu0 %1040 }
 0x1d6   :  { %1222 = vbcast.lane.b32.xlu1 %v1824_v25, 264 }
 0x1d9   :  { %v1168_v7 = vpop.permute.xlu1 %1167  ;;  %v1164_v12 = vpop.permute.xlu0 %1163 }
 0x1dd   :  { %v1862_v44 = vpop.permute.xlu1 %1055  ;;  %v1864_v25 = vpop.permute.xlu0 %1051 }
 0x1e1   :  { %v1179_v20 = vpop.permute.xlu1 %1178  ;;  %v1175_v22 = vpop.permute.xlu0 %1174 }
 0x1e5   :  { %v1866_v19 = vpop.permute.xlu1 %1066  ;;  %v1868_v40 = vpop.permute.xlu0 %1062 }
 0x1e9   :  { %v1870_v41 = vpop.permute.xlu1 %1189  ;;  %v1872_v34 = vpop.permute.xlu0 %1185 }
 0x1ed   :  { %v1074_v58 = vpop.permute.xlu0 %1073 }
 0x1f1   :  { %v1197_v3 = vpop.permute.xlu0 %1196 }
 0x234   :  { %v936_v11 = vpop.permute.xlu1 %935 }
 0x235   :  { %v938_v45 = vsub.f32 %v1413_v52, %v936_v11 }
 0x237   :  { %v939_v27 = vmax.f32 %v938_v45, 0.0 }
 0x238   :  { %v1078_v53 = vpop.permute.xlu1 %1077 }
 0x239   :  { %v941_v43 = vcombine.high %v939_v27, %v939_v27  ;;  %v948_v21 = vrot.slane %v939_v27, %v1539_v31  ;;  %1393 = vrot.lane.b32.xlu1 %v939_v27, %s1417_s23 }
 0x23b   :  { %v955_v50 = vrot.slane %v941_v43, %v1539_v31  ;;  %v956_v49 = vcombine.high %v948_v21, %v948_v21  ;;  %v964_v54 = vrot.slane %v948_v21, %v1539_v31 }
 0x23c   :  { %v1201_v46 = vpop.permute.xlu1 %1200 }
 0x23d   :  { %v978_v56 = vrot.slane %v956_v49, %v1539_v31  ;;  %v986_v60 = vcombine.high %v964_v54, %v964_v54  ;;  %v1082_v61 = vrot.slane %v964_v54, %v1487_v4  ;;  %v957_v2 = vcombine.high %v955_v50, %v955_v50 }
 0x23e   :  { %v1884_v47 = vrot.slane %v955_v50, %v1539_v31 }
 0x23f   :  { %v988_v62 = vcombine.high %v978_v56, %v978_v56  ;;  %v1086_v9 = vrot.slane %v978_v56, %v1487_v4  ;;  %v1090_v63 = vrot.slane %v986_v60, %v1487_v4  ;;  %v1119_v59 = vmul.f32 %v1082_v61, %v997_v32 }
 0x240   :  { %v1120_v10 = vmul.f32 %v1082_v61, %v1001_v26  ;;  %v985_v0 = vrot.slane %v957_v2, %v1539_v31  ;;  %v987_v13 = vcombine.high %v1884_v47, %v1884_v47  ;;  %v1898_v15 = vrot.slane %v1884_v47, %v1487_v4  ;;  %v1901_v26 = vpop.permute.xlu0 %1262 }
 0x241   :  { %v1094_v57 = vrot.slane %v988_v62, %v1487_v4  ;;  %v1121_v55 = vmul.f32 %v1086_v9, %v1008_v18  ;;  %v1122_v17 = vmul.f32 %v1086_v9, %v1012_v37  ;;  %v1123_v5 = vmul.f32 %v1090_v63, %v1019_v24  ;;  %v1903_v37 = vpop.permute.xlu1 %1266 }
 0x242   :  { %v1124_v1 = vmul.f32 %v1090_v63, %v1023_v33  ;;  %v1224_v23 = vadd.f32 %v1142_v42, %v1119_v59  ;;  %v1225_v14 = vadd.f32 %v1146_v36, %v1120_v10  ;;  %v989_v28 = vcombine.high %v985_v0, %v985_v0 }
 0x243   :  { %v1125_v29 = vmul.f32 %v1094_v57, %v1030_v51  ;;  %v1126_v16 = vmul.f32 %v1094_v57, %v1034_v35  ;;  %v1226_v30 = vadd.f32 %v1153_v6, %v1121_v55  ;;  %v1227_v31 = vadd.f32 %v1157_v38, %v1122_v17 }
 0x244   :  { %v1228_v32 = vadd.f32 %v1164_v12, %v1123_v5  ;;  %v1229_v11 = vadd.f32 %v1168_v7, %v1124_v1  ;;  %v1240_v52 = vmax.f32 %v1224_v23, 0.0  ;;  %v1241_v45 = vmax.f32 %v1225_v14, 0.0  ;;  %v1208_v60 = vpop.permute.xlu0 %1207 }
 0x245   :  { %v1230_v27 = vadd.f32 %v1175_v22, %v1125_v29  ;;  %v1231_v43 = vadd.f32 %v1179_v20, %v1126_v16  ;;  %v1242_v21 = vmax.f32 %v1226_v30, 0.0  ;;  %v1243_v18 = vmax.f32 %v1227_v31, 0.0  ;;  %v1212_v63 = vpop.permute.xlu1 %1211 }
 0x246   :  { %v1244_v33 = vmax.f32 %v1228_v32, 0.0  ;;  %v1245_v24 = vmax.f32 %v1229_v11, 0.0  ;;  %v1110_v36 = vrot.slane %v989_v28, %v1487_v4  ;;  %v1102_v35 = vrot.slane %v985_v0, %v1487_v4 }
 0x247   :  { %v1246_v51 = vmax.f32 %v1230_v27, 0.0  ;;  %v1247_v42 = vmax.f32 %v1231_v43, 0.0  ;;  %v1268_v38 = vmul.f32 %v1901_v26, %v1240_v52  ;;  %v1270_v6 = vmul.f32 %v1901_v26, %v1242_v21 }
 0x248   :  { %v1133_v7 = vmul.f32 %v1110_v36, %v1074_v58  ;;  %v1134_v12 = vmul.f32 %v1110_v36, %v1078_v53  ;;  %v1129_v20 = vmul.f32 %v1102_v35, %v1864_v25  ;;  %v1130_v22 = vmul.f32 %v1102_v35, %v1862_v44  ;;  %v1219_v31 = vpop.permute.xlu0 %1218 }
 0x249   :  { %v1272_v50 = vmul.f32 %v1901_v26, %v1244_v33  ;;  %v1274_v49 = vmul.f32 %v1901_v26, %v1246_v51  ;;  %v1284_v54 = vsel %vm799_vm15, %v1268_v38, 0.0  ;;  %v1293_v56 = vsel %vm799_vm15, %v1270_v6, 0.0  ;;  %v1223_v33 = vpop.permute.xlu1 %1222 }
 0x24a   :  { %v1234_v61 = vadd.f32 %v1197_v3, %v1129_v20  ;;  %v1235_v2 = vadd.f32 %v1201_v46, %v1130_v22  ;;  %v1269_v62 = vmul.f32 %v1903_v37, %v1241_v45  ;;  %v1271_v58 = vmul.f32 %v1903_v37, %v1243_v18 }
 0x24b   :  { %v1302_v53 = vsel %vm799_vm15, %v1272_v50, 0.0  ;;  %v1311_v25 = vsel %vm799_vm15, %v1274_v49, 0.0  ;;  %v1273_v44 = vmul.f32 %v1903_v37, %v1245_v24  ;;  %v1275_v9 = vmul.f32 %v1903_v37, %v1247_v42 }
 0x24c   :  { %v1250_v59 = vmax.f32 %v1234_v61, 0.0  ;;  %v1251_v10 = vmax.f32 %v1235_v2, 0.0  ;;  %v1285_v0 = vsel %vm799_vm15, %v1269_v62, 0.0  ;;  %v1294_v3 = vsel %vm799_vm15, %v1271_v58, 0.0 }
 0x24d   :  { %v1286_v46 = vadd.f32 %v1285_v0, %v1284_v54  ;;  %v1295_v57 = vadd.f32 %v1294_v3, %v1293_v56  ;;  %v1303_v55 = vsel %vm799_vm15, %v1273_v44, 0.0  ;;  %v1312_v17 = vsel %vm799_vm15, %v1275_v9, 0.0 }
 0x24e   :  { %v1278_v5 = vmul.f32 %v1901_v26, %v1250_v59  ;;  %v1279_v1 = vmul.f32 %v1903_v37, %v1251_v10  ;;  %v1304_v23 = vadd.f32 %v1303_v55, %v1302_v53  ;;  %v1313_v14 = vadd.f32 %v1312_v17, %v1311_v25 }
 0x24f   :  { %v1287_v28 = vrot.slane %v1286_v46, 4  ;;  %v1296_v29 = vrot.slane %v1295_v57, 4  ;;  %v1106_v16 = vrot.slane %v987_v13, %v1487_v4  ;;  %v1127_v30 = vmul.f32 %v1898_v15, %v1860_v48 }
 0x250   :  { %v1329_v32 = vsel %vm799_vm15, %v1278_v5, 0.0  ;;  %v1305_v11 = vrot.slane %v1304_v23, 4  ;;  %v1314_v52 = vrot.slane %v1313_v14, 4  ;;  %v1330_v45 = vsel %vm799_vm15, %v1279_v1, 0.0 }
 0x251   :  { %v1288_v27 = vadd.f32 %v1287_v28, %v1286_v46  ;;  %v1297_v43 = vadd.f32 %v1296_v29, %v1295_v57  ;;  %v1128_v21 = vmul.f32 %v1898_v15, %v1858_v39  ;;  %v1131_v18 = vmul.f32 %v1106_v16, %v1868_v40 }
 0x252   :  { %v1306_v47 = vadd.f32 %v1305_v11, %v1304_v23  ;;  %v1232_v4 = vadd.f32 %v1872_v34, %v1127_v30  ;;  %v1132_v48 = vmul.f32 %v1106_v16, %v1866_v19  ;;  %v1238_v13 = vadd.f32 %v1219_v31, %v1133_v7 }
 0x253   :  { %v1289_v24 = vrot.slane %v1288_v27, 2  ;;  %v1298_v36 = vrot.slane %v1297_v43, 2  ;;  %v1233_v35 = vadd.f32 %v1870_v41, %v1128_v21  ;;  %v1236_v51 = vadd.f32 %v1208_v60, %v1131_v18 }
 0x254   :  { %v1248_v42 = vmax.f32 %v1232_v4, 0.0  ;;  %v1237_v38 = vadd.f32 %v1212_v63, %v1132_v48  ;;  %v1254_v6 = vmax.f32 %v1238_v13, 0.0  ;;  %v1239_v20 = vadd.f32 %v1223_v33, %v1134_v12 }
 0x255   :  { %v1249_v22 = vmax.f32 %v1233_v35, 0.0  ;;  %v1252_v39 = vmax.f32 %v1236_v51, 0.0  ;;  %v1290_v15 = vadd.f32 %v1289_v24, %v1288_v27  ;;  %v1299_v40 = vadd.f32 %v1298_v36, %v1297_v43 }
 0x256   :  { %v1276_v50 = vmul.f32 %v1901_v26, %v1248_v42  ;;  %v1253_v49 = vmax.f32 %v1237_v38, 0.0  ;;  %v1282_v34 = vmul.f32 %v1901_v26, %v1254_v6  ;;  %v1255_v19 = vmax.f32 %v1239_v20, 0.0 }
 0x257   :  { %v1277_v7 = vmul.f32 %v1903_v37, %v1249_v22  ;;  %v1280_v54 = vmul.f32 %v1901_v26, %v1252_v39  ;;  %v1291_v41 = vrot.slane %v1290_v15, 1  ;;  %v1300_v56 = vrot.slane %v1299_v40, 1 }
 0x258   :  { %v1320_v60 = vsel %vm799_vm15, %v1276_v50, 0.0  ;;  %v1281_v12 = vmul.f32 %v1903_v37, %v1253_v49  ;;  %v1347_v61 = vsel %vm799_vm15, %v1282_v34, 0.0  ;;  %v1283_v2 = vmul.f32 %v1903_v37, %v1255_v19 }
 0x259   :  { %v1321_v62 = vsel %vm799_vm15, %v1277_v7, 0.0  ;;  %v1338_v58 = vsel %vm799_vm15, %v1280_v54, 0.0  ;;  %v1292_v53 = vadd.f32 %v1291_v41, %v1290_v15  ;;  %v1301_v25 = vadd.f32 %v1300_v56, %v1299_v40 }
 0x25a   :  { %v1322_v44 = vadd.f32 %v1321_v62, %v1320_v60  ;;  %v1339_v9 = vsel %vm799_vm15, %v1281_v12, 0.0  ;;  %v1348_v26 = vsel %vm799_vm15, %v1283_v2, 0.0  ;;  %v1307_v63 = vrot.slane %v1306_v47, 2 }
 0x25b   :  { %v1340_v59 = vadd.f32 %v1339_v9, %v1338_v58  ;;  %v1349_v10 = vadd.f32 %v1348_v26, %v1347_v61  ;;  %v1315_v0 = vadd.f32 %v1314_v52, %v1313_v14  ;;  %v1331_v3 = vadd.f32 %v1330_v45, %v1329_v32 }
 0x25c   :  { %v1323_v46 = vrot.slane %v1322_v44, 4  ;;  %v1308_v57 = vadd.f32 %v1307_v63, %v1306_v47  ;;  %v1358_v37 = vadd.f32 %v1889_v8, %v1292_v53  ;;  %v1359_v55 = vadd.f32 %v1889_v8, %v1301_v25 }
 0x25d   :  { %v1341_v17 = vrot.slane %v1340_v59, 4  ;;  %v1350_v5 = vrot.slane %v1349_v10, 4  ;;  %v1316_v1 = vrot.slane %v1315_v0, 2  ;;  %v1332_v23 = vrot.slane %v1331_v3, 4 }
 0x25e   :  { %v1309_v28 = vrot.slane %v1308_v57, 1  ;;  %v1324_v29 = vadd.f32 %v1323_v46, %v1322_v44  ;;  %v1367_v16 = vmax.f32 %v1359_v55, 0.0  ;;  %v1366_v32 = vmax.f32 %v1358_v37, 0.0 }
 0x25f   :  { %v1342_v30 = vadd.f32 %v1341_v17, %v1340_v59  ;;  %v1351_v31 = vadd.f32 %v1350_v5, %v1349_v10  ;;  %v1317_v11 = vadd.f32 %v1316_v1, %v1315_v0  ;;  %v1333_v27 = vadd.f32 %v1332_v23, %v1331_v3 }
 0x260   :  { %v1310_v43 = vadd.f32 %v1309_v28, %v1308_v57  ;;  %v1325_v14 = vrot.slane %v1324_v29, 2  ;;  %v1382_v4 = vsel %vm915_vm7, %v1367_v16, %v1366_v32 }
 0x261   :  { %v1343_v52 = vrot.slane %v1342_v30, 2  ;;  %v1352_v45 = vrot.slane %v1351_v31, 2  ;;  %v1318_v21 = vrot.slane %v1317_v11, 1  ;;  %v1334_v18 = vrot.slane %v1333_v27, 2 }
 0x262   :  { %v1326_v33 = vadd.f32 %v1325_v14, %v1324_v29  ;;  %v1360_v47 = vadd.f32 %v1889_v8, %v1310_v43 }
 0x263   :  { %v1344_v48 = vadd.f32 %v1343_v52, %v1342_v30  ;;  %v1353_v13 = vadd.f32 %v1352_v45, %v1351_v31  ;;  %v1319_v24 = vadd.f32 %v1318_v21, %v1317_v11  ;;  %v1335_v36 = vadd.f32 %v1334_v18, %v1333_v27 }
 0x264   :  { %v1327_v35 = vrot.slane %v1326_v33, 1  ;;  %v1368_v51 = vmax.f32 %v1360_v47, 0.0 }
 0x265   :  { %v1345_v42 = vrot.slane %v1344_v48, 1  ;;  %v1354_v38 = vrot.slane %v1353_v13, 1  ;;  %v1336_v6 = vrot.slane %v1335_v36, 1  ;;  %v1361_v20 = vadd.f32 %v1889_v8, %v1319_v24 }
 0x266   :  { %v1328_v22 = vadd.f32 %v1327_v35, %v1326_v33  ;;  %v1383_v39 = vsel %vm918_vm8, %v1368_v51, %v1382_v4 }
 0x267   :  { %v1346_v15 = vadd.f32 %v1345_v42, %v1344_v48  ;;  %v1337_v40 = vadd.f32 %v1336_v6, %v1335_v36  ;;  %v1355_v50 = vadd.f32 %v1354_v38, %v1353_v13  ;;  %v1369_v49 = vmax.f32 %v1361_v20, 0.0 }
 0x268   :  { %v1362_v34 = vadd.f32 %v1889_v8, %v1328_v22 }
 0x269   :  { %v1363_v19 = vadd.f32 %v1889_v8, %v1337_v40  ;;  %v1364_v7 = vadd.f32 %v1889_v8, %v1346_v15  ;;  %v1365_v54 = vadd.f32 %v1889_v8, %v1355_v50  ;;  %v1384_v41 = vsel %vm921_vm9, %v1369_v49, %v1383_v39 }
 0x26a   :  { %v1370_v56 = vmax.f32 %v1362_v34, 0.0 }
 0x26b   :  { %v1371_v60 = vmax.f32 %v1363_v19, 0.0  ;;  %v1373_v12 = vmax.f32 %v1365_v54, 0.0  ;;  %v1372_v61 = vmax.f32 %v1364_v7, 0.0 }
 0x26c   :  { %v1385_v2 = vsel %vm924_vm10, %v1370_v56, %v1384_v41 }
 0x26d   :  { %v1386_v62 = vsel %vm927_vm11, %v1371_v60, %v1385_v2 }
 0x26e   :  { %v1387_v58 = vsel %vm930_vm12, %v1372_v61, %v1386_v62 }
 0x26f   :  { %v1388_v53 = vsel %vm933_vm13, %v1373_v12, %v1387_v58 }
 0x270   :  { %1389 = vrot.lane.b32.xlu0 %v1388_v53, %s1417_s23 }
 0x2ab   :  { %v1394_v25 = vpop.permute.xlu1 %1393 }
 0x2ac   :  { %1396 = vst.msk [vmem:[%s1987_s11] sm:$0xff] %vm607_vm5, %v1394_v25 }
 0x2e2   :  { %v1390_v8 = vpop.permute.xlu0 %1389 }
 0x2e3   :  { %1392 = vst.msk [vmem:[%s1988_s10] sm:$0xff] %vm607_vm5, %v1390_v8 }

</bundles_post_ra>
